<compile_context>
chip_gen: v7x
topology: tpu7x:2x2x1
jax: 0.10.0
libtpu: 0.0.40
codegen_flags: <defaults>
</compile_context>

<pallas_src>
import jax
import jax.numpy as jnp
from jax.experimental import pallas as pl
from jax.experimental.pallas import tpu as pltpu

_LANES = 128
_SUB = 8


def _attn_kernel(g_ref, x_ref, wg_ref, wx_ref, wp_ref, b1_ref, bp_ref, out_ref):
    """One (batch, spatial-tile) block.

    g_ref  : (1, F_g, TS, 128) VMEM (io dtype)
    x_ref  : (1, F_l, TS, 128) VMEM (io dtype)
    wg_ref : (F_g, F_int) SMEM f32  (BN-folded)
    wx_ref : (F_l, F_int) SMEM f32  (BN-folded)
    wp_ref : (F_int,)     SMEM f32  (BN-folded psi weight)
    b1_ref : (F_int,)     SMEM f32  (bg + bx, BN-folded)
    bp_ref : (1,)         SMEM f32  (BN-folded psi bias)
    out_ref: (1, F_l, TS, 128) VMEM (io dtype)
    """
    F_g, F_int = wg_ref.shape
    F_l = wx_ref.shape[0]
    TS = g_ref.shape[2]

    # Sublane strip size: 8 rows for 4-byte dtypes, 16 for 2-byte (bf16 packing
    # means sublane offsets should stay tile-aligned).
    itemsize = jnp.dtype(g_ref.dtype).itemsize
    sub = _SUB * max(1, 4 // itemsize)

    def strip_body(row, rows):
        sl = pl.ds(row, rows)
        # Per-strip channel vregs only (~12-20 vregs live): no spills at big TS.
        g = g_ref[0, :, sl, :].astype(jnp.float32)   # (F_g, rows, 128)
        x = x_ref[0, :, sl, :].astype(jnp.float32)   # (F_l, rows, 128)

        # Unrolled scalar-weight VPU FMAs; channel counts are static & tiny.
        s_acc = None
        for f in range(F_int):
            acc = wg_ref[0, f] * g[0]
            for c in range(1, F_g):
                acc = acc + wg_ref[c, f] * g[c]
            for c in range(F_l):
                acc = acc + wx_ref[c, f] * x[c]
            acc = jnp.maximum(acc + b1_ref[f], 0.0)            # ReLU
            term = wp_ref[f] * acc
            s_acc = term if s_acc is None else s_acc + term

        gate = jax.nn.sigmoid(s_acc + bp_ref[0])               # (rows, 128)
        out_ref[0, :, sl, :] = (x * gate[None, :, :]).astype(out_ref.dtype)

    if TS % sub == 0:
        @pl.loop(0, TS // sub)
        def _(s):
            strip_body(pl.multiple_of(s * sub, sub), sub)
    else:
        # Tiny / full-extent tile (TS == full spatial extent): single strip.
        strip_body(0, TS)


def _fold_bn(w, b, gamma, beta, mean, var, eps=1e-5):
    """Fold inference-mode BatchNorm into a 1x1 conv (matmul) weight/bias."""
    scale = gamma / jnp.sqrt(var + eps)        # (out_ch,)
    w_f = w * scale[None, :]                   # (in_ch, out_ch)
    b_f = (b - mean) * scale + beta            # (out_ch,)
    return w_f, b_f


def _round_up(v, m):
    return ((v + m - 1) // m) * m


def _choose_tile(S8, N, stream_channels, bytes_el, vmem_budget, min_ts):
    """Largest spatial tile (in sublanes) whose double-buffered footprint fits."""
    if S8 <= min_ts:
        return S8                               # full extent (block == array dim)

    def fits(ts):
        return 2 * stream_channels * ts * _LANES * bytes_el <= vmem_budget

    ts = min_ts
    for cand in (1024, 512, 256, 128, 64, 32, 16, 8):
        if cand < min_ts or cand > S8:
            continue
        if fits(cand):
            ts = cand
            break
    # Keep >= 4 grid steps so both v7x TensorCores get work.
    while ts > min_ts and N * pl.cdiv(S8, ts) < 4:
        ts //= 2
    return ts


def attention_block(g, x, params, *, io_dtype=None,
                    vmem_limit_bytes=32 * 1024 * 1024):
    """g: (N, F_g, H, W), x: (N, F_l, H, W)  ->  (N, F_l, H, W) (io dtype)."""
    N, F_g, H, W = g.shape
    F_l = x.shape[1]
    HW = H * W

    # Fold inference-mode BN into the 1x1 convs (weights stay f32 in SMEM).
    wg, bg = _fold_bn(params["wg"], params["bg"], params["gn_gamma"],
                      params["gn_beta"], params["gn_mean"], params["gn_var"])
    wx, bx = _fold_bn(params["wx"], params["bx"], params["xn_gamma"],
                      params["xn_beta"], params["xn_mean"], params["xn_var"])
    wp, bp = _fold_bn(params["wp"], params["bp"], params["pn_gamma"],
                      params["pn_beta"], params["pn_mean"], params["pn_var"])
    F_int = wg.shape[1]
    b1 = (bg + bx).astype(jnp.float32)            # (F_int,) combined bias
    wp = wp.reshape(-1).astype(jnp.float32)       # (F_int,)
    bp = bp.reshape(-1).astype(jnp.float32)       # (1,)
    wg = wg.astype(jnp.float32)
    wx = wx.astype(jnp.float32)

    io_dtype = jnp.dtype(g.dtype if io_dtype is None else io_dtype)
    bytes_el = io_dtype.itemsize
    min_ts = _SUB * max(1, 4 // bytes_el)

    # Channels-first, spatial on the lane axis.  For HW % 128 == 0 (typical
    # power-of-two UNet sizes) these reshapes are free; otherwise we pad once
    # here (extra HBM pass -- keep HW a multiple of 128 upstream if possible).
    HW_pad = _round_up(HW, _LANES)
    g3 = g.astype(io_dtype).reshape(N, F_g, HW)
    x3 = x.astype(io_dtype).reshape(N, F_l, HW)
    if HW_pad != HW:
        pad = [(0, 0), (0, 0), (0, HW_pad - HW)]
        g3 = jnp.pad(g3, pad)
        x3 = jnp.pad(x3, pad)
    S8 = HW_pad // _LANES
    g4 = g3.reshape(N, F_g, S8, _LANES)
    x4 = x3.reshape(N, F_l, S8, _LANES)

    # Spatial tile chosen against the real VMEM limit (with headroom).
    vmem_budget = (vmem_limit_bytes * 3) // 4
    TS = _choose_tile(S8, N, F_g + 2 * F_l, bytes_el, vmem_budget, min_ts)
    grid = (N, pl.cdiv(S8, TS))   # ragged last block handled by Pallas

    smem = pl.BlockSpec(memory_space=pltpu.MemorySpace.SMEM)

    out4 = pl.pallas_call(
        _attn_kernel,
        out_shape=jax.ShapeDtypeStruct((N, F_l, S8, _LANES), io_dtype),
        grid_spec=pltpu.PrefetchScalarGridSpec(
            num_scalar_prefetch=0,
            grid=grid,
            in_specs=[
                pl.BlockSpec((1, F_g, TS, _LANES), lambda n, s: (n, 0, s, 0)),
                pl.BlockSpec((1, F_l, TS, _LANES), lambda n, s: (n, 0, s, 0)),
                smem,   # wg
                smem,   # wx
                smem,   # wp
                smem,   # b1 = bg + bx
                smem,   # bp
            ],
            out_specs=pl.BlockSpec((1, F_l, TS, _LANES), lambda n, s: (n, 0, s, 0)),
        ),
        compiler_params=pltpu.CompilerParams(
            dimension_semantics=("parallel", "parallel"),
            vmem_limit_bytes=vmem_limit_bytes,
        ),
        cost_estimate=pl.CostEstimate(
            flops=int(2 * N * HW * F_int * (F_g + F_l + 1)),
            transcendentals=int(N * HW),
            bytes_accessed=int(bytes_el * N * HW * (F_g + 2 * F_l)),
        ),
    )(g4, x4, wg, wx, wp, b1, bp)

    out = out4.reshape(N, F_l, HW_pad)
    if HW_pad != HW:
        out = out[:, :, :HW]
    return out.reshape(N, F_l, H, W)


def init_params(key, F_g, F_l, F_int):
    ks = jax.random.split(key, 6)
    return {
        # 1x1 conv weights stored as (in_ch, out_ch)
        "wg": jax.random.normal(ks[0], (F_g, F_int), jnp.float32) * 0.1,
        "bg": jax.random.normal(ks[1], (F_int,), jnp.float32) * 0.1,
        "wx": jax.random.normal(ks[2], (F_l, F_int), jnp.float32) * 0.1,
        "bx": jax.random.normal(ks[3], (F_int,), jnp.float32) * 0.1,
        "wp": jax.random.normal(ks[4], (F_int, 1), jnp.float32) * 0.1,
        "bp": jax.random.normal(ks[5], (1,), jnp.float32) * 0.1,
        # BatchNorm (inference) params — deterministic, non-trivial values
        "gn_gamma": jnp.linspace(0.9, 1.1, F_int, dtype=jnp.float32),
        "gn_beta": jnp.linspace(-0.1, 0.1, F_int, dtype=jnp.float32),
        "gn_mean": jnp.linspace(-0.05, 0.05, F_int, dtype=jnp.float32),
        "gn_var": jnp.linspace(0.8, 1.2, F_int, dtype=jnp.float32),
        "xn_gamma": jnp.linspace(1.1, 0.9, F_int, dtype=jnp.float32),
        "xn_beta": jnp.linspace(0.1, -0.1, F_int, dtype=jnp.float32),
        "xn_mean": jnp.linspace(0.05, -0.05, F_int, dtype=jnp.float32),
        "xn_var": jnp.linspace(1.2, 0.8, F_int, dtype=jnp.float32),
        "pn_gamma": jnp.array([1.05], jnp.float32),
        "pn_beta": jnp.array([0.02], jnp.float32),
        "pn_mean": jnp.array([0.01], jnp.float32),
        "pn_var": jnp.array([0.95], jnp.float32),
    }


def _reference(g, x, params):
    """Plain-JAX reference (same folded-BN inference semantics)."""
    wg, bg = _fold_bn(params["wg"], params["bg"], params["gn_gamma"],
                      params["gn_beta"], params["gn_mean"], params["gn_var"])
    wx, bx = _fold_bn(params["wx"], params["bx"], params["xn_gamma"],
                      params["xn_beta"], params["xn_mean"], params["xn_var"])
    wp, bp = _fold_bn(params["wp"], params["bp"], params["pn_gamma"],
                      params["pn_beta"], params["pn_mean"], params["pn_var"])
    gm = jnp.transpose(g, (0, 2, 3, 1))
    xm = jnp.transpose(x, (0, 2, 3, 1))
    g1 = gm @ wg + bg
    x1 = xm @ wx + bx
    p = jnp.maximum(g1 + x1, 0.0)
    s = jax.nn.sigmoid(p @ wp + bp)
    out = xm * s
    return jnp.transpose(out, (0, 3, 1, 2))


if __name__ == "__main__":
    F_g, F_l, F_int = 4, 4, 8
    key = jax.random.PRNGKey(0)
    kg, kx, kp = jax.random.split(key, 3)
    params = init_params(kp, F_g, F_l, F_int)

    # Case 1: small shape (spec size), f32 I/O -> tight tolerance vs reference.
    N, H, W = 2, 16, 16
    g = jax.random.normal(kg, (N, F_g, H, W), jnp.float32)
    x = jax.random.normal(kx, (N, F_l, H, W), jnp.float32)
    out = jax.block_until_ready(attention_block(g, x, params))
    ref = _reference(g, x, params)
    assert out.shape == (N, F_l, H, W)
    assert jnp.allclose(out, ref, atol=1e-5, rtol=1e-4), "f32 mismatch vs reference"

    # Case 2: bf16 HBM storage (memory-bound chips); compute stays f32 in-kernel.
    out_bf = jax.block_until_ready(
        attention_block(g, x, params, io_dtype=jnp.bfloat16))
    assert jnp.allclose(out_bf.astype(jnp.float32), ref, atol=5e-2, rtol=5e-2), \
        "bf16 mismatch vs reference"

    # Case 3: exercises the multi-strip in-kernel loop + >=4-grid-step cap.
    N2, H2, W2 = 2, 64, 64
    kg2, kx2 = jax.random.split(jax.random.PRNGKey(1), 2)
    g2 = jax.random.normal(kg2, (N2, F_g, H2, W2), jnp.float32)
    x2 = jax.random.normal(kx2, (N2, F_l, H2, W2), jnp.float32)
    out2 = jax.block_until_ready(attention_block(g2, x2, params))
    ref2 = _reference(g2, x2, params)
    assert jnp.allclose(out2, ref2, atol=1e-5, rtol=1e-4), "strip-loop mismatch"

    # Case 4: ragged spatial grid (tile does not divide the spatial extent).
    N3, H3, W3 = 1, 24, 96          # HW = 2304 -> S8 = 18
    kg3, kx3 = jax.random.split(jax.random.PRNGKey(2), 2)
    g3i = jax.random.normal(kg3, (N3, F_g, H3, W3), jnp.float32)
    x3i = jax.random.normal(kx3, (N3, F_l, H3, W3), jnp.float32)
    out3 = jax.block_until_ready(attention_block(g3i, x3i, params))
    ref3 = _reference(g3i, x3i, params)
    assert jnp.allclose(out3, ref3, atol=1e-5, rtol=1e-4), "ragged-grid mismatch"

    print("KERNEL_OK")
</pallas_src>

<mosaic_0001>
module attributes {stable_mosaic.version = 11 : i64} {
  func.func @_attn_kernel(%arg0: i32, %arg1: i32, %arg2: memref<1x4x2x128xf32, #tpu.memory_space<vmem>>, %arg3: memref<1x4x2x128xf32, #tpu.memory_space<vmem>>, %arg4: memref<4x8xf32, #tpu.memory_space<smem>>, %arg5: memref<4x8xf32, #tpu.memory_space<smem>>, %arg6: memref<8xf32, #tpu.memory_space<smem>>, %arg7: memref<8xf32, #tpu.memory_space<smem>>, %arg8: memref<1xf32, #tpu.memory_space<smem>>, %arg9: memref<1x4x2x128xf32, #tpu.memory_space<vmem>>) attributes {dimension_semantics = [#tpu.dimension_semantics<parallel>, #tpu.dimension_semantics<parallel>], iteration_bounds = array<i64: 2, 1>, scalar_prefetch = 0 : i64, scratch_operands = 0 : i64, tpu.core_type = #tpu.core_type<tc>, window_params = [{transform_indices = @transform_0, window_bounds = array<i64: 1, 4, 2, 128>}, {transform_indices = @transform_1, window_bounds = array<i64: 1, 4, 2, 128>}, {transform_indices = @transform_2, window_bounds = array<i64: 4, 8>}, {transform_indices = @transform_3, window_bounds = array<i64: 4, 8>}, {transform_indices = @transform_4, window_bounds = array<i64: 8>}, {transform_indices = @transform_5, window_bounds = array<i64: 8>}, {transform_indices = @transform_6, window_bounds = array<i64: 1>}, {transform_indices = @transform_7, window_bounds = array<i64: 1, 4, 2, 128>}]} {
    %c0 = arith.constant 0 : index
    %c0_0 = arith.constant 0 : index
    %c0_1 = arith.constant 0 : index
    %c0_2 = arith.constant 0 : index
    %0 = vector.load %arg2[%c0, %c0_0, %c0_1, %c0_2] : memref<1x4x2x128xf32, #tpu.memory_space<vmem>>, vector<1x4x2x128xf32>
    %1 = vector.shape_cast %0 : vector<1x4x2x128xf32> to vector<4x2x128xf32>
    %c0_3 = arith.constant 0 : index
    %c0_4 = arith.constant 0 : index
    %c0_5 = arith.constant 0 : index
    %c0_6 = arith.constant 0 : index
    %2 = vector.load %arg3[%c0_3, %c0_4, %c0_5, %c0_6] : memref<1x4x2x128xf32, #tpu.memory_space<vmem>>, vector<1x4x2x128xf32>
    %3 = vector.shape_cast %2 : vector<1x4x2x128xf32> to vector<4x2x128xf32>
    %c0_7 = arith.constant 0 : index
    %c0_8 = arith.constant 0 : index
    %4 = memref.load %arg4[%c0_7, %c0_8] : memref<4x8xf32, #tpu.memory_space<smem>>
    %5 = vector.extract_strided_slice %1 {offsets = [0, 0, 0], sizes = [1, 2, 128], strides = [1, 1, 1]} : vector<4x2x128xf32> to vector<1x2x128xf32>
    %6 = vector.shape_cast %5 : vector<1x2x128xf32> to vector<2x128xf32>
    %7 = vector.broadcast %4 : f32 to vector<2x128xf32>
    %8 = arith.mulf %7, %6 : vector<2x128xf32>
    %c1 = arith.constant 1 : index
    %c0_9 = arith.constant 0 : index
    %9 = memref.load %arg4[%c1, %c0_9] : memref<4x8xf32, #tpu.memory_space<smem>>
    %10 = vector.extract_strided_slice %1 {offsets = [1, 0, 0], sizes = [1, 2, 128], strides = [1, 1, 1]} : vector<4x2x128xf32> to vector<1x2x128xf32>
    %11 = vector.shape_cast %10 : vector<1x2x128xf32> to vector<2x128xf32>
    %12 = vector.broadcast %9 : f32 to vector<2x128xf32>
    %13 = arith.mulf %12, %11 : vector<2x128xf32>
    %14 = arith.addf %8, %13 : vector<2x128xf32>
    %c2 = arith.constant 2 : index
    %c0_10 = arith.constant 0 : index
    %15 = memref.load %arg4[%c2, %c0_10] : memref<4x8xf32, #tpu.memory_space<smem>>
    %16 = vector.extract_strided_slice %1 {offsets = [2, 0, 0], sizes = [1, 2, 128], strides = [1, 1, 1]} : vector<4x2x128xf32> to vector<1x2x128xf32>
    %17 = vector.shape_cast %16 : vector<1x2x128xf32> to vector<2x128xf32>
    %18 = vector.broadcast %15 : f32 to vector<2x128xf32>
    %19 = arith.mulf %18, %17 : vector<2x128xf32>
    %20 = arith.addf %14, %19 : vector<2x128xf32>
    %c3 = arith.constant 3 : index
    %c0_11 = arith.constant 0 : index
    %21 = memref.load %arg4[%c3, %c0_11] : memref<4x8xf32, #tpu.memory_space<smem>>
    %22 = vector.extract_strided_slice %1 {offsets = [3, 0, 0], sizes = [1, 2, 128], strides = [1, 1, 1]} : vector<4x2x128xf32> to vector<1x2x128xf32>
    %23 = vector.shape_cast %22 : vector<1x2x128xf32> to vector<2x128xf32>
    %24 = vector.broadcast %21 : f32 to vector<2x128xf32>
    %25 = arith.mulf %24, %23 : vector<2x128xf32>
    %26 = arith.addf %20, %25 : vector<2x128xf32>
    %c0_12 = arith.constant 0 : index
    %c0_13 = arith.constant 0 : index
    %27 = memref.load %arg5[%c0_12, %c0_13] : memref<4x8xf32, #tpu.memory_space<smem>>
    %28 = vector.extract_strided_slice %3 {offsets = [0, 0, 0], sizes = [1, 2, 128], strides = [1, 1, 1]} : vector<4x2x128xf32> to vector<1x2x128xf32>
    %29 = vector.shape_cast %28 : vector<1x2x128xf32> to vector<2x128xf32>
    %30 = vector.broadcast %27 : f32 to vector<2x128xf32>
    %31 = arith.mulf %30, %29 : vector<2x128xf32>
    %32 = arith.addf %26, %31 : vector<2x128xf32>
    %c1_14 = arith.constant 1 : index
    %c0_15 = arith.constant 0 : index
    %33 = memref.load %arg5[%c1_14, %c0_15] : memref<4x8xf32, #tpu.memory_space<smem>>
    %34 = vector.extract_strided_slice %3 {offsets = [1, 0, 0], sizes = [1, 2, 128], strides = [1, 1, 1]} : vector<4x2x128xf32> to vector<1x2x128xf32>
    %35 = vector.shape_cast %34 : vector<1x2x128xf32> to vector<2x128xf32>
    %36 = vector.broadcast %33 : f32 to vector<2x128xf32>
    %37 = arith.mulf %36, %35 : vector<2x128xf32>
    %38 = arith.addf %32, %37 : vector<2x128xf32>
    %c2_16 = arith.constant 2 : index
    %c0_17 = arith.constant 0 : index
    %39 = memref.load %arg5[%c2_16, %c0_17] : memref<4x8xf32, #tpu.memory_space<smem>>
    %40 = vector.extract_strided_slice %3 {offsets = [2, 0, 0], sizes = [1, 2, 128], strides = [1, 1, 1]} : vector<4x2x128xf32> to vector<1x2x128xf32>
    %41 = vector.shape_cast %40 : vector<1x2x128xf32> to vector<2x128xf32>
    %42 = vector.broadcast %39 : f32 to vector<2x128xf32>
    %43 = arith.mulf %42, %41 : vector<2x128xf32>
    %44 = arith.addf %38, %43 : vector<2x128xf32>
    %c3_18 = arith.constant 3 : index
    %c0_19 = arith.constant 0 : index
    %45 = memref.load %arg5[%c3_18, %c0_19] : memref<4x8xf32, #tpu.memory_space<smem>>
    %46 = vector.extract_strided_slice %3 {offsets = [3, 0, 0], sizes = [1, 2, 128], strides = [1, 1, 1]} : vector<4x2x128xf32> to vector<1x2x128xf32>
    %47 = vector.shape_cast %46 : vector<1x2x128xf32> to vector<2x128xf32>
    %48 = vector.broadcast %45 : f32 to vector<2x128xf32>
    %49 = arith.mulf %48, %47 : vector<2x128xf32>
    %50 = arith.addf %44, %49 : vector<2x128xf32>
    %c0_20 = arith.constant 0 : index
    %51 = memref.load %arg7[%c0_20] : memref<8xf32, #tpu.memory_space<smem>>
    %52 = vector.broadcast %51 : f32 to vector<2x128xf32>
    %53 = arith.addf %50, %52 : vector<2x128xf32>
    %cst = arith.constant 0.000000e+00 : f32
    %54 = vector.broadcast %cst : f32 to vector<2x128xf32>
    %55 = arith.maximumf %53, %54 : vector<2x128xf32>
    %c0_21 = arith.constant 0 : index
    %56 = memref.load %arg6[%c0_21] : memref<8xf32, #tpu.memory_space<smem>>
    %57 = vector.broadcast %56 : f32 to vector<2x128xf32>
    %58 = arith.mulf %57, %55 : vector<2x128xf32>
    %c0_22 = arith.constant 0 : index
    %c1_23 = arith.constant 1 : index
    %59 = memref.load %arg4[%c0_22, %c1_23] : memref<4x8xf32, #tpu.memory_space<smem>>
    %60 = vector.extract_strided_slice %1 {offsets = [0, 0, 0], sizes = [1, 2, 128], strides = [1, 1, 1]} : vector<4x2x128xf32> to vector<1x2x128xf32>
    %61 = vector.shape_cast %60 : vector<1x2x128xf32> to vector<2x128xf32>
    %62 = vector.broadcast %59 : f32 to vector<2x128xf32>
    %63 = arith.mulf %62, %61 : vector<2x128xf32>
    %c1_24 = arith.constant 1 : index
    %c1_25 = arith.constant 1 : index
    %64 = memref.load %arg4[%c1_24, %c1_25] : memref<4x8xf32, #tpu.memory_space<smem>>
    %65 = vector.extract_strided_slice %1 {offsets = [1, 0, 0], sizes = [1, 2, 128], strides = [1, 1, 1]} : vector<4x2x128xf32> to vector<1x2x128xf32>
    %66 = vector.shape_cast %65 : vector<1x2x128xf32> to vector<2x128xf32>
    %67 = vector.broadcast %64 : f32 to vector<2x128xf32>
    %68 = arith.mulf %67, %66 : vector<2x128xf32>
    %69 = arith.addf %63, %68 : vector<2x128xf32>
    %c2_26 = arith.constant 2 : index
    %c1_27 = arith.constant 1 : index
    %70 = memref.load %arg4[%c2_26, %c1_27] : memref<4x8xf32, #tpu.memory_space<smem>>
    %71 = vector.extract_strided_slice %1 {offsets = [2, 0, 0], sizes = [1, 2, 128], strides = [1, 1, 1]} : vector<4x2x128xf32> to vector<1x2x128xf32>
    %72 = vector.shape_cast %71 : vector<1x2x128xf32> to vector<2x128xf32>
    %73 = vector.broadcast %70 : f32 to vector<2x128xf32>
    %74 = arith.mulf %73, %72 : vector<2x128xf32>
    %75 = arith.addf %69, %74 : vector<2x128xf32>
    %c3_28 = arith.constant 3 : index
    %c1_29 = arith.constant 1 : index
    %76 = memref.load %arg4[%c3_28, %c1_29] : memref<4x8xf32, #tpu.memory_space<smem>>
    %77 = vector.extract_strided_slice %1 {offsets = [3, 0, 0], sizes = [1, 2, 128], strides = [1, 1, 1]} : vector<4x2x128xf32> to vector<1x2x128xf32>
    %78 = vector.shape_cast %77 : vector<1x2x128xf32> to vector<2x128xf32>
    %79 = vector.broadcast %76 : f32 to vector<2x128xf32>
    %80 = arith.mulf %79, %78 : vector<2x128xf32>
    %81 = arith.addf %75, %80 : vector<2x128xf32>
    %c0_30 = arith.constant 0 : index
    %c1_31 = arith.constant 1 : index
    %82 = memref.load %arg5[%c0_30, %c1_31] : memref<4x8xf32, #tpu.memory_space<smem>>
    %83 = vector.extract_strided_slice %3 {offsets = [0, 0, 0], sizes = [1, 2, 128], strides = [1, 1, 1]} : vector<4x2x128xf32> to vector<1x2x128xf32>
    %84 = vector.shape_cast %83 : vector<1x2x128xf32> to vector<2x128xf32>
    %85 = vector.broadcast %82 : f32 to vector<2x128xf32>
    %86 = arith.mulf %85, %84 : vector<2x128xf32>
    %87 = arith.addf %81, %86 : vector<2x128xf32>
    %c1_32 = arith.constant 1 : index
    %c1_33 = arith.constant 1 : index
    %88 = memref.load %arg5[%c1_32, %c1_33] : memref<4x8xf32, #tpu.memory_space<smem>>
    %89 = vector.extract_strided_slice %3 {offsets = [1, 0, 0], sizes = [1, 2, 128], strides = [1, 1, 1]} : vector<4x2x128xf32> to vector<1x2x128xf32>
    %90 = vector.shape_cast %89 : vector<1x2x128xf32> to vector<2x128xf32>
    %91 = vector.broadcast %88 : f32 to vector<2x128xf32>
    %92 = arith.mulf %91, %90 : vector<2x128xf32>
    %93 = arith.addf %87, %92 : vector<2x128xf32>
    %c2_34 = arith.constant 2 : index
    %c1_35 = arith.constant 1 : index
    %94 = memref.load %arg5[%c2_34, %c1_35] : memref<4x8xf32, #tpu.memory_space<smem>>
    %95 = vector.extract_strided_slice %3 {offsets = [2, 0, 0], sizes = [1, 2, 128], strides = [1, 1, 1]} : vector<4x2x128xf32> to vector<1x2x128xf32>
    %96 = vector.shape_cast %95 : vector<1x2x128xf32> to vector<2x128xf32>
    %97 = vector.broadcast %94 : f32 to vector<2x128xf32>
    %98 = arith.mulf %97, %96 : vector<2x128xf32>
    %99 = arith.addf %93, %98 : vector<2x128xf32>
    %c3_36 = arith.constant 3 : index
    %c1_37 = arith.constant 1 : index
    %100 = memref.load %arg5[%c3_36, %c1_37] : memref<4x8xf32, #tpu.memory_space<smem>>
    %101 = vector.extract_strided_slice %3 {offsets = [3, 0, 0], sizes = [1, 2, 128], strides = [1, 1, 1]} : vector<4x2x128xf32> to vector<1x2x128xf32>
    %102 = vector.shape_cast %101 : vector<1x2x128xf32> to vector<2x128xf32>
    %103 = vector.broadcast %100 : f32 to vector<2x128xf32>
    %104 = arith.mulf %103, %102 : vector<2x128xf32>
    %105 = arith.addf %99, %104 : vector<2x128xf32>
    %c1_38 = arith.constant 1 : index
    %106 = memref.load %arg7[%c1_38] : memref<8xf32, #tpu.memory_space<smem>>
    %107 = vector.broadcast %106 : f32 to vector<2x128xf32>
    %108 = arith.addf %105, %107 : vector<2x128xf32>
    %cst_39 = arith.constant 0.000000e+00 : f32
    %109 = vector.broadcast %cst_39 : f32 to vector<2x128xf32>
    %110 = arith.maximumf %108, %109 : vector<2x128xf32>
    %c1_40 = arith.constant 1 : index
    %111 = memref.load %arg6[%c1_40] : memref<8xf32, #tpu.memory_space<smem>>
    %112 = vector.broadcast %111 : f32 to vector<2x128xf32>
    %113 = arith.mulf %112, %110 : vector<2x128xf32>
    %114 = arith.addf %58, %113 : vector<2x128xf32>
    %c0_41 = arith.constant 0 : index
    %c2_42 = arith.constant 2 : index
    %115 = memref.load %arg4[%c0_41, %c2_42] : memref<4x8xf32, #tpu.memory_space<smem>>
    %116 = vector.extract_strided_slice %1 {offsets = [0, 0, 0], sizes = [1, 2, 128], strides = [1, 1, 1]} : vector<4x2x128xf32> to vector<1x2x128xf32>
    %117 = vector.shape_cast %116 : vector<1x2x128xf32> to vector<2x128xf32>
    %118 = vector.broadcast %115 : f32 to vector<2x128xf32>
    %119 = arith.mulf %118, %117 : vector<2x128xf32>
    %c1_43 = arith.constant 1 : index
    %c2_44 = arith.constant 2 : index
    %120 = memref.load %arg4[%c1_43, %c2_44] : memref<4x8xf32, #tpu.memory_space<smem>>
    %121 = vector.extract_strided_slice %1 {offsets = [1, 0, 0], sizes = [1, 2, 128], strides = [1, 1, 1]} : vector<4x2x128xf32> to vector<1x2x128xf32>
    %122 = vector.shape_cast %121 : vector<1x2x128xf32> to vector<2x128xf32>
    %123 = vector.broadcast %120 : f32 to vector<2x128xf32>
    %124 = arith.mulf %123, %122 : vector<2x128xf32>
    %125 = arith.addf %119, %124 : vector<2x128xf32>
    %c2_45 = arith.constant 2 : index
    %c2_46 = arith.constant 2 : index
    %126 = memref.load %arg4[%c2_45, %c2_46] : memref<4x8xf32, #tpu.memory_space<smem>>
    %127 = vector.extract_strided_slice %1 {offsets = [2, 0, 0], sizes = [1, 2, 128], strides = [1, 1, 1]} : vector<4x2x128xf32> to vector<1x2x128xf32>
    %128 = vector.shape_cast %127 : vector<1x2x128xf32> to vector<2x128xf32>
    %129 = vector.broadcast %126 : f32 to vector<2x128xf32>
    %130 = arith.mulf %129, %128 : vector<2x128xf32>
    %131 = arith.addf %125, %130 : vector<2x128xf32>
    %c3_47 = arith.constant 3 : index
    %c2_48 = arith.constant 2 : index
    %132 = memref.load %arg4[%c3_47, %c2_48] : memref<4x8xf32, #tpu.memory_space<smem>>
    %133 = vector.extract_strided_slice %1 {offsets = [3, 0, 0], sizes = [1, 2, 128], strides = [1, 1, 1]} : vector<4x2x128xf32> to vector<1x2x128xf32>
    %134 = vector.shape_cast %133 : vector<1x2x128xf32> to vector<2x128xf32>
    %135 = vector.broadcast %132 : f32 to vector<2x128xf32>
    %136 = arith.mulf %135, %134 : vector<2x128xf32>
    %137 = arith.addf %131, %136 : vector<2x128xf32>
    %c0_49 = arith.constant 0 : index
    %c2_50 = arith.constant 2 : index
    %138 = memref.load %arg5[%c0_49, %c2_50] : memref<4x8xf32, #tpu.memory_space<smem>>
    %139 = vector.extract_strided_slice %3 {offsets = [0, 0, 0], sizes = [1, 2, 128], strides = [1, 1, 1]} : vector<4x2x128xf32> to vector<1x2x128xf32>
    %140 = vector.shape_cast %139 : vector<1x2x128xf32> to vector<2x128xf32>
    %141 = vector.broadcast %138 : f32 to vector<2x128xf32>
    %142 = arith.mulf %141, %140 : vector<2x128xf32>
    %143 = arith.addf %137, %142 : vector<2x128xf32>
    %c1_51 = arith.constant 1 : index
    %c2_52 = arith.constant 2 : index
    %144 = memref.load %arg5[%c1_51, %c2_52] : memref<4x8xf32, #tpu.memory_space<smem>>
    %145 = vector.extract_strided_slice %3 {offsets = [1, 0, 0], sizes = [1, 2, 128], strides = [1, 1, 1]} : vector<4x2x128xf32> to vector<1x2x128xf32>
    %146 = vector.shape_cast %145 : vector<1x2x128xf32> to vector<2x128xf32>
    %147 = vector.broadcast %144 : f32 to vector<2x128xf32>
    %148 = arith.mulf %147, %146 : vector<2x128xf32>
    %149 = arith.addf %143, %148 : vector<2x128xf32>
    %c2_53 = arith.constant 2 : index
    %c2_54 = arith.constant 2 : index
    %150 = memref.load %arg5[%c2_53, %c2_54] : memref<4x8xf32, #tpu.memory_space<smem>>
    %151 = vector.extract_strided_slice %3 {offsets = [2, 0, 0], sizes = [1, 2, 128], strides = [1, 1, 1]} : vector<4x2x128xf32> to vector<1x2x128xf32>
    %152 = vector.shape_cast %151 : vector<1x2x128xf32> to vector<2x128xf32>
    %153 = vector.broadcast %150 : f32 to vector<2x128xf32>
    %154 = arith.mulf %153, %152 : vector<2x128xf32>
    %155 = arith.addf %149, %154 : vector<2x128xf32>
    %c3_55 = arith.constant 3 : index
    %c2_56 = arith.constant 2 : index
    %156 = memref.load %arg5[%c3_55, %c2_56] : memref<4x8xf32, #tpu.memory_space<smem>>
    %157 = vector.extract_strided_slice %3 {offsets = [3, 0, 0], sizes = [1, 2, 128], strides = [1, 1, 1]} : vector<4x2x128xf32> to vector<1x2x128xf32>
    %158 = vector.shape_cast %157 : vector<1x2x128xf32> to vector<2x128xf32>
    %159 = vector.broadcast %156 : f32 to vector<2x128xf32>
    %160 = arith.mulf %159, %158 : vector<2x128xf32>
    %161 = arith.addf %155, %160 : vector<2x128xf32>
    %c2_57 = arith.constant 2 : index
    %162 = memref.load %arg7[%c2_57] : memref<8xf32, #tpu.memory_space<smem>>
    %163 = vector.broadcast %162 : f32 to vector<2x128xf32>
    %164 = arith.addf %161, %163 : vector<2x128xf32>
    %cst_58 = arith.constant 0.000000e+00 : f32
    %165 = vector.broadcast %cst_58 : f32 to vector<2x128xf32>
    %166 = arith.maximumf %164, %165 : vector<2x128xf32>
    %c2_59 = arith.constant 2 : index
    %167 = memref.load %arg6[%c2_59] : memref<8xf32, #tpu.memory_space<smem>>
    %168 = vector.broadcast %167 : f32 to vector<2x128xf32>
    %169 = arith.mulf %168, %166 : vector<2x128xf32>
    %170 = arith.addf %114, %169 : vector<2x128xf32>
    %c0_60 = arith.constant 0 : index
    %c3_61 = arith.constant 3 : index
    %171 = memref.load %arg4[%c0_60, %c3_61] : memref<4x8xf32, #tpu.memory_space<smem>>
    %172 = vector.extract_strided_slice %1 {offsets = [0, 0, 0], sizes = [1, 2, 128], strides = [1, 1, 1]} : vector<4x2x128xf32> to vector<1x2x128xf32>
    %173 = vector.shape_cast %172 : vector<1x2x128xf32> to vector<2x128xf32>
    %174 = vector.broadcast %171 : f32 to vector<2x128xf32>
    %175 = arith.mulf %174, %173 : vector<2x128xf32>
    %c1_62 = arith.constant 1 : index
    %c3_63 = arith.constant 3 : index
    %176 = memref.load %arg4[%c1_62, %c3_63] : memref<4x8xf32, #tpu.memory_space<smem>>
    %177 = vector.extract_strided_slice %1 {offsets = [1, 0, 0], sizes = [1, 2, 128], strides = [1, 1, 1]} : vector<4x2x128xf32> to vector<1x2x128xf32>
    %178 = vector.shape_cast %177 : vector<1x2x128xf32> to vector<2x128xf32>
    %179 = vector.broadcast %176 : f32 to vector<2x128xf32>
    %180 = arith.mulf %179, %178 : vector<2x128xf32>
    %181 = arith.addf %175, %180 : vector<2x128xf32>
    %c2_64 = arith.constant 2 : index
    %c3_65 = arith.constant 3 : index
    %182 = memref.load %arg4[%c2_64, %c3_65] : memref<4x8xf32, #tpu.memory_space<smem>>
    %183 = vector.extract_strided_slice %1 {offsets = [2, 0, 0], sizes = [1, 2, 128], strides = [1, 1, 1]} : vector<4x2x128xf32> to vector<1x2x128xf32>
    %184 = vector.shape_cast %183 : vector<1x2x128xf32> to vector<2x128xf32>
    %185 = vector.broadcast %182 : f32 to vector<2x128xf32>
    %186 = arith.mulf %185, %184 : vector<2x128xf32>
    %187 = arith.addf %181, %186 : vector<2x128xf32>
    %c3_66 = arith.constant 3 : index
    %c3_67 = arith.constant 3 : index
    %188 = memref.load %arg4[%c3_66, %c3_67] : memref<4x8xf32, #tpu.memory_space<smem>>
    %189 = vector.extract_strided_slice %1 {offsets = [3, 0, 0], sizes = [1, 2, 128], strides = [1, 1, 1]} : vector<4x2x128xf32> to vector<1x2x128xf32>
    %190 = vector.shape_cast %189 : vector<1x2x128xf32> to vector<2x128xf32>
    %191 = vector.broadcast %188 : f32 to vector<2x128xf32>
    %192 = arith.mulf %191, %190 : vector<2x128xf32>
    %193 = arith.addf %187, %192 : vector<2x128xf32>
    %c0_68 = arith.constant 0 : index
    %c3_69 = arith.constant 3 : index
    %194 = memref.load %arg5[%c0_68, %c3_69] : memref<4x8xf32, #tpu.memory_space<smem>>
    %195 = vector.extract_strided_slice %3 {offsets = [0, 0, 0], sizes = [1, 2, 128], strides = [1, 1, 1]} : vector<4x2x128xf32> to vector<1x2x128xf32>
    %196 = vector.shape_cast %195 : vector<1x2x128xf32> to vector<2x128xf32>
    %197 = vector.broadcast %194 : f32 to vector<2x128xf32>
    %198 = arith.mulf %197, %196 : vector<2x128xf32>
    %199 = arith.addf %193, %198 : vector<2x128xf32>
    %c1_70 = arith.constant 1 : index
    %c3_71 = arith.constant 3 : index
    %200 = memref.load %arg5[%c1_70, %c3_71] : memref<4x8xf32, #tpu.memory_space<smem>>
    %201 = vector.extract_strided_slice %3 {offsets = [1, 0, 0], sizes = [1, 2, 128], strides = [1, 1, 1]} : vector<4x2x128xf32> to vector<1x2x128xf32>
    %202 = vector.shape_cast %201 : vector<1x2x128xf32> to vector<2x128xf32>
    %203 = vector.broadcast %200 : f32 to vector<2x128xf32>
    %204 = arith.mulf %203, %202 : vector<2x128xf32>
    %205 = arith.addf %199, %204 : vector<2x128xf32>
    %c2_72 = arith.constant 2 : index
    %c3_73 = arith.constant 3 : index
    %206 = memref.load %arg5[%c2_72, %c3_73] : memref<4x8xf32, #tpu.memory_space<smem>>
    %207 = vector.extract_strided_slice %3 {offsets = [2, 0, 0], sizes = [1, 2, 128], strides = [1, 1, 1]} : vector<4x2x128xf32> to vector<1x2x128xf32>
    %208 = vector.shape_cast %207 : vector<1x2x128xf32> to vector<2x128xf32>
    %209 = vector.broadcast %206 : f32 to vector<2x128xf32>
    %210 = arith.mulf %209, %208 : vector<2x128xf32>
    %211 = arith.addf %205, %210 : vector<2x128xf32>
    %c3_74 = arith.constant 3 : index
    %c3_75 = arith.constant 3 : index
    %212 = memref.load %arg5[%c3_74, %c3_75] : memref<4x8xf32, #tpu.memory_space<smem>>
    %213 = vector.extract_strided_slice %3 {offsets = [3, 0, 0], sizes = [1, 2, 128], strides = [1, 1, 1]} : vector<4x2x128xf32> to vector<1x2x128xf32>
    %214 = vector.shape_cast %213 : vector<1x2x128xf32> to vector<2x128xf32>
    %215 = vector.broadcast %212 : f32 to vector<2x128xf32>
    %216 = arith.mulf %215, %214 : vector<2x128xf32>
    %217 = arith.addf %211, %216 : vector<2x128xf32>
    %c3_76 = arith.constant 3 : index
    %218 = memref.load %arg7[%c3_76] : memref<8xf32, #tpu.memory_space<smem>>
    %219 = vector.broadcast %218 : f32 to vector<2x128xf32>
    %220 = arith.addf %217, %219 : vector<2x128xf32>
    %cst_77 = arith.constant 0.000000e+00 : f32
    %221 = vector.broadcast %cst_77 : f32 to vector<2x128xf32>
    %222 = arith.maximumf %220, %221 : vector<2x128xf32>
    %c3_78 = arith.constant 3 : index
    %223 = memref.load %arg6[%c3_78] : memref<8xf32, #tpu.memory_space<smem>>
    %224 = vector.broadcast %223 : f32 to vector<2x128xf32>
    %225 = arith.mulf %224, %222 : vector<2x128xf32>
    %226 = arith.addf %170, %225 : vector<2x128xf32>
    %c0_79 = arith.constant 0 : index
    %c4 = arith.constant 4 : index
    %227 = memref.load %arg4[%c0_79, %c4] : memref<4x8xf32, #tpu.memory_space<smem>>
    %228 = vector.extract_strided_slice %1 {offsets = [0, 0, 0], sizes = [1, 2, 128], strides = [1, 1, 1]} : vector<4x2x128xf32> to vector<1x2x128xf32>
    %229 = vector.shape_cast %228 : vector<1x2x128xf32> to vector<2x128xf32>
    %230 = vector.broadcast %227 : f32 to vector<2x128xf32>
    %231 = arith.mulf %230, %229 : vector<2x128xf32>
    %c1_80 = arith.constant 1 : index
    %c4_81 = arith.constant 4 : index
    %232 = memref.load %arg4[%c1_80, %c4_81] : memref<4x8xf32, #tpu.memory_space<smem>>
    %233 = vector.extract_strided_slice %1 {offsets = [1, 0, 0], sizes = [1, 2, 128], strides = [1, 1, 1]} : vector<4x2x128xf32> to vector<1x2x128xf32>
    %234 = vector.shape_cast %233 : vector<1x2x128xf32> to vector<2x128xf32>
    %235 = vector.broadcast %232 : f32 to vector<2x128xf32>
    %236 = arith.mulf %235, %234 : vector<2x128xf32>
    %237 = arith.addf %231, %236 : vector<2x128xf32>
    %c2_82 = arith.constant 2 : index
    %c4_83 = arith.constant 4 : index
    %238 = memref.load %arg4[%c2_82, %c4_83] : memref<4x8xf32, #tpu.memory_space<smem>>
    %239 = vector.extract_strided_slice %1 {offsets = [2, 0, 0], sizes = [1, 2, 128], strides = [1, 1, 1]} : vector<4x2x128xf32> to vector<1x2x128xf32>
    %240 = vector.shape_cast %239 : vector<1x2x128xf32> to vector<2x128xf32>
    %241 = vector.broadcast %238 : f32 to vector<2x128xf32>
    %242 = arith.mulf %241, %240 : vector<2x128xf32>
    %243 = arith.addf %237, %242 : vector<2x128xf32>
    %c3_84 = arith.constant 3 : index
    %c4_85 = arith.constant 4 : index
    %244 = memref.load %arg4[%c3_84, %c4_85] : memref<4x8xf32, #tpu.memory_space<smem>>
    %245 = vector.extract_strided_slice %1 {offsets = [3, 0, 0], sizes = [1, 2, 128], strides = [1, 1, 1]} : vector<4x2x128xf32> to vector<1x2x128xf32>
    %246 = vector.shape_cast %245 : vector<1x2x128xf32> to vector<2x128xf32>
    %247 = vector.broadcast %244 : f32 to vector<2x128xf32>
    %248 = arith.mulf %247, %246 : vector<2x128xf32>
    %249 = arith.addf %243, %248 : vector<2x128xf32>
    %c0_86 = arith.constant 0 : index
    %c4_87 = arith.constant 4 : index
    %250 = memref.load %arg5[%c0_86, %c4_87] : memref<4x8xf32, #tpu.memory_space<smem>>
    %251 = vector.extract_strided_slice %3 {offsets = [0, 0, 0], sizes = [1, 2, 128], strides = [1, 1, 1]} : vector<4x2x128xf32> to vector<1x2x128xf32>
    %252 = vector.shape_cast %251 : vector<1x2x128xf32> to vector<2x128xf32>
    %253 = vector.broadcast %250 : f32 to vector<2x128xf32>
    %254 = arith.mulf %253, %252 : vector<2x128xf32>
    %255 = arith.addf %249, %254 : vector<2x128xf32>
    %c1_88 = arith.constant 1 : index
    %c4_89 = arith.constant 4 : index
    %256 = memref.load %arg5[%c1_88, %c4_89] : memref<4x8xf32, #tpu.memory_space<smem>>
    %257 = vector.extract_strided_slice %3 {offsets = [1, 0, 0], sizes = [1, 2, 128], strides = [1, 1, 1]} : vector<4x2x128xf32> to vector<1x2x128xf32>
    %258 = vector.shape_cast %257 : vector<1x2x128xf32> to vector<2x128xf32>
    %259 = vector.broadcast %256 : f32 to vector<2x128xf32>
    %260 = arith.mulf %259, %258 : vector<2x128xf32>
    %261 = arith.addf %255, %260 : vector<2x128xf32>
    %c2_90 = arith.constant 2 : index
    %c4_91 = arith.constant 4 : index
    %262 = memref.load %arg5[%c2_90, %c4_91] : memref<4x8xf32, #tpu.memory_space<smem>>
    %263 = vector.extract_strided_slice %3 {offsets = [2, 0, 0], sizes = [1, 2, 128], strides = [1, 1, 1]} : vector<4x2x128xf32> to vector<1x2x128xf32>
    %264 = vector.shape_cast %263 : vector<1x2x128xf32> to vector<2x128xf32>
    %265 = vector.broadcast %262 : f32 to vector<2x128xf32>
    %266 = arith.mulf %265, %264 : vector<2x128xf32>
    %267 = arith.addf %261, %266 : vector<2x128xf32>
    %c3_92 = arith.constant 3 : index
    %c4_93 = arith.constant 4 : index
    %268 = memref.load %arg5[%c3_92, %c4_93] : memref<4x8xf32, #tpu.memory_space<smem>>
    %269 = vector.extract_strided_slice %3 {offsets = [3, 0, 0], sizes = [1, 2, 128], strides = [1, 1, 1]} : vector<4x2x128xf32> to vector<1x2x128xf32>
    %270 = vector.shape_cast %269 : vector<1x2x128xf32> to vector<2x128xf32>
    %271 = vector.broadcast %268 : f32 to vector<2x128xf32>
    %272 = arith.mulf %271, %270 : vector<2x128xf32>
    %273 = arith.addf %267, %272 : vector<2x128xf32>
    %c4_94 = arith.constant 4 : index
    %274 = memref.load %arg7[%c4_94] : memref<8xf32, #tpu.memory_space<smem>>
    %275 = vector.broadcast %274 : f32 to vector<2x128xf32>
    %276 = arith.addf %273, %275 : vector<2x128xf32>
    %cst_95 = arith.constant 0.000000e+00 : f32
    %277 = vector.broadcast %cst_95 : f32 to vector<2x128xf32>
    %278 = arith.maximumf %276, %277 : vector<2x128xf32>
    %c4_96 = arith.constant 4 : index
    %279 = memref.load %arg6[%c4_96] : memref<8xf32, #tpu.memory_space<smem>>
    %280 = vector.broadcast %279 : f32 to vector<2x128xf32>
    %281 = arith.mulf %280, %278 : vector<2x128xf32>
    %282 = arith.addf %226, %281 : vector<2x128xf32>
    %c0_97 = arith.constant 0 : index
    %c5 = arith.constant 5 : index
    %283 = memref.load %arg4[%c0_97, %c5] : memref<4x8xf32, #tpu.memory_space<smem>>
    %284 = vector.extract_strided_slice %1 {offsets = [0, 0, 0], sizes = [1, 2, 128], strides = [1, 1, 1]} : vector<4x2x128xf32> to vector<1x2x128xf32>
    %285 = vector.shape_cast %284 : vector<1x2x128xf32> to vector<2x128xf32>
    %286 = vector.broadcast %283 : f32 to vector<2x128xf32>
    %287 = arith.mulf %286, %285 : vector<2x128xf32>
    %c1_98 = arith.constant 1 : index
    %c5_99 = arith.constant 5 : index
    %288 = memref.load %arg4[%c1_98, %c5_99] : memref<4x8xf32, #tpu.memory_space<smem>>
    %289 = vector.extract_strided_slice %1 {offsets = [1, 0, 0], sizes = [1, 2, 128], strides = [1, 1, 1]} : vector<4x2x128xf32> to vector<1x2x128xf32>
    %290 = vector.shape_cast %289 : vector<1x2x128xf32> to vector<2x128xf32>
    %291 = vector.broadcast %288 : f32 to vector<2x128xf32>
    %292 = arith.mulf %291, %290 : vector<2x128xf32>
    %293 = arith.addf %287, %292 : vector<2x128xf32>
    %c2_100 = arith.constant 2 : index
    %c5_101 = arith.constant 5 : index
    %294 = memref.load %arg4[%c2_100, %c5_101] : memref<4x8xf32, #tpu.memory_space<smem>>
    %295 = vector.extract_strided_slice %1 {offsets = [2, 0, 0], sizes = [1, 2, 128], strides = [1, 1, 1]} : vector<4x2x128xf32> to vector<1x2x128xf32>
    %296 = vector.shape_cast %295 : vector<1x2x128xf32> to vector<2x128xf32>
    %297 = vector.broadcast %294 : f32 to vector<2x128xf32>
    %298 = arith.mulf %297, %296 : vector<2x128xf32>
    %299 = arith.addf %293, %298 : vector<2x128xf32>
    %c3_102 = arith.constant 3 : index
    %c5_103 = arith.constant 5 : index
    %300 = memref.load %arg4[%c3_102, %c5_103] : memref<4x8xf32, #tpu.memory_space<smem>>
    %301 = vector.extract_strided_slice %1 {offsets = [3, 0, 0], sizes = [1, 2, 128], strides = [1, 1, 1]} : vector<4x2x128xf32> to vector<1x2x128xf32>
    %302 = vector.shape_cast %301 : vector<1x2x128xf32> to vector<2x128xf32>
    %303 = vector.broadcast %300 : f32 to vector<2x128xf32>
    %304 = arith.mulf %303, %302 : vector<2x128xf32>
    %305 = arith.addf %299, %304 : vector<2x128xf32>
    %c0_104 = arith.constant 0 : index
    %c5_105 = arith.constant 5 : index
    %306 = memref.load %arg5[%c0_104, %c5_105] : memref<4x8xf32, #tpu.memory_space<smem>>
    %307 = vector.extract_strided_slice %3 {offsets = [0, 0, 0], sizes = [1, 2, 128], strides = [1, 1, 1]} : vector<4x2x128xf32> to vector<1x2x128xf32>
    %308 = vector.shape_cast %307 : vector<1x2x128xf32> to vector<2x128xf32>
    %309 = vector.broadcast %306 : f32 to vector<2x128xf32>
    %310 = arith.mulf %309, %308 : vector<2x128xf32>
    %311 = arith.addf %305, %310 : vector<2x128xf32>
    %c1_106 = arith.constant 1 : index
    %c5_107 = arith.constant 5 : index
    %312 = memref.load %arg5[%c1_106, %c5_107] : memref<4x8xf32, #tpu.memory_space<smem>>
    %313 = vector.extract_strided_slice %3 {offsets = [1, 0, 0], sizes = [1, 2, 128], strides = [1, 1, 1]} : vector<4x2x128xf32> to vector<1x2x128xf32>
    %314 = vector.shape_cast %313 : vector<1x2x128xf32> to vector<2x128xf32>
    %315 = vector.broadcast %312 : f32 to vector<2x128xf32>
    %316 = arith.mulf %315, %314 : vector<2x128xf32>
    %317 = arith.addf %311, %316 : vector<2x128xf32>
    %c2_108 = arith.constant 2 : index
    %c5_109 = arith.constant 5 : index
    %318 = memref.load %arg5[%c2_108, %c5_109] : memref<4x8xf32, #tpu.memory_space<smem>>
    %319 = vector.extract_strided_slice %3 {offsets = [2, 0, 0], sizes = [1, 2, 128], strides = [1, 1, 1]} : vector<4x2x128xf32> to vector<1x2x128xf32>
    %320 = vector.shape_cast %319 : vector<1x2x128xf32> to vector<2x128xf32>
    %321 = vector.broadcast %318 : f32 to vector<2x128xf32>
    %322 = arith.mulf %321, %320 : vector<2x128xf32>
    %323 = arith.addf %317, %322 : vector<2x128xf32>
    %c3_110 = arith.constant 3 : index
    %c5_111 = arith.constant 5 : index
    %324 = memref.load %arg5[%c3_110, %c5_111] : memref<4x8xf32, #tpu.memory_space<smem>>
    %325 = vector.extract_strided_slice %3 {offsets = [3, 0, 0], sizes = [1, 2, 128], strides = [1, 1, 1]} : vector<4x2x128xf32> to vector<1x2x128xf32>
    %326 = vector.shape_cast %325 : vector<1x2x128xf32> to vector<2x128xf32>
    %327 = vector.broadcast %324 : f32 to vector<2x128xf32>
    %328 = arith.mulf %327, %326 : vector<2x128xf32>
    %329 = arith.addf %323, %328 : vector<2x128xf32>
    %c5_112 = arith.constant 5 : index
    %330 = memref.load %arg7[%c5_112] : memref<8xf32, #tpu.memory_space<smem>>
    %331 = vector.broadcast %330 : f32 to vector<2x128xf32>
    %332 = arith.addf %329, %331 : vector<2x128xf32>
    %cst_113 = arith.constant 0.000000e+00 : f32
    %333 = vector.broadcast %cst_113 : f32 to vector<2x128xf32>
    %334 = arith.maximumf %332, %333 : vector<2x128xf32>
    %c5_114 = arith.constant 5 : index
    %335 = memref.load %arg6[%c5_114] : memref<8xf32, #tpu.memory_space<smem>>
    %336 = vector.broadcast %335 : f32 to vector<2x128xf32>
    %337 = arith.mulf %336, %334 : vector<2x128xf32>
    %338 = arith.addf %282, %337 : vector<2x128xf32>
    %c0_115 = arith.constant 0 : index
    %c6 = arith.constant 6 : index
    %339 = memref.load %arg4[%c0_115, %c6] : memref<4x8xf32, #tpu.memory_space<smem>>
    %340 = vector.extract_strided_slice %1 {offsets = [0, 0, 0], sizes = [1, 2, 128], strides = [1, 1, 1]} : vector<4x2x128xf32> to vector<1x2x128xf32>
    %341 = vector.shape_cast %340 : vector<1x2x128xf32> to vector<2x128xf32>
    %342 = vector.broadcast %339 : f32 to vector<2x128xf32>
    %343 = arith.mulf %342, %341 : vector<2x128xf32>
    %c1_116 = arith.constant 1 : index
    %c6_117 = arith.constant 6 : index
    %344 = memref.load %arg4[%c1_116, %c6_117] : memref<4x8xf32, #tpu.memory_space<smem>>
    %345 = vector.extract_strided_slice %1 {offsets = [1, 0, 0], sizes = [1, 2, 128], strides = [1, 1, 1]} : vector<4x2x128xf32> to vector<1x2x128xf32>
    %346 = vector.shape_cast %345 : vector<1x2x128xf32> to vector<2x128xf32>
    %347 = vector.broadcast %344 : f32 to vector<2x128xf32>
    %348 = arith.mulf %347, %346 : vector<2x128xf32>
    %349 = arith.addf %343, %348 : vector<2x128xf32>
    %c2_118 = arith.constant 2 : index
    %c6_119 = arith.constant 6 : index
    %350 = memref.load %arg4[%c2_118, %c6_119] : memref<4x8xf32, #tpu.memory_space<smem>>
    %351 = vector.extract_strided_slice %1 {offsets = [2, 0, 0], sizes = [1, 2, 128], strides = [1, 1, 1]} : vector<4x2x128xf32> to vector<1x2x128xf32>
    %352 = vector.shape_cast %351 : vector<1x2x128xf32> to vector<2x128xf32>
    %353 = vector.broadcast %350 : f32 to vector<2x128xf32>
    %354 = arith.mulf %353, %352 : vector<2x128xf32>
    %355 = arith.addf %349, %354 : vector<2x128xf32>
    %c3_120 = arith.constant 3 : index
    %c6_121 = arith.constant 6 : index
    %356 = memref.load %arg4[%c3_120, %c6_121] : memref<4x8xf32, #tpu.memory_space<smem>>
    %357 = vector.extract_strided_slice %1 {offsets = [3, 0, 0], sizes = [1, 2, 128], strides = [1, 1, 1]} : vector<4x2x128xf32> to vector<1x2x128xf32>
    %358 = vector.shape_cast %357 : vector<1x2x128xf32> to vector<2x128xf32>
    %359 = vector.broadcast %356 : f32 to vector<2x128xf32>
    %360 = arith.mulf %359, %358 : vector<2x128xf32>
    %361 = arith.addf %355, %360 : vector<2x128xf32>
    %c0_122 = arith.constant 0 : index
    %c6_123 = arith.constant 6 : index
    %362 = memref.load %arg5[%c0_122, %c6_123] : memref<4x8xf32, #tpu.memory_space<smem>>
    %363 = vector.extract_strided_slice %3 {offsets = [0, 0, 0], sizes = [1, 2, 128], strides = [1, 1, 1]} : vector<4x2x128xf32> to vector<1x2x128xf32>
    %364 = vector.shape_cast %363 : vector<1x2x128xf32> to vector<2x128xf32>
    %365 = vector.broadcast %362 : f32 to vector<2x128xf32>
    %366 = arith.mulf %365, %364 : vector<2x128xf32>
    %367 = arith.addf %361, %366 : vector<2x128xf32>
    %c1_124 = arith.constant 1 : index
    %c6_125 = arith.constant 6 : index
    %368 = memref.load %arg5[%c1_124, %c6_125] : memref<4x8xf32, #tpu.memory_space<smem>>
    %369 = vector.extract_strided_slice %3 {offsets = [1, 0, 0], sizes = [1, 2, 128], strides = [1, 1, 1]} : vector<4x2x128xf32> to vector<1x2x128xf32>
    %370 = vector.shape_cast %369 : vector<1x2x128xf32> to vector<2x128xf32>
    %371 = vector.broadcast %368 : f32 to vector<2x128xf32>
    %372 = arith.mulf %371, %370 : vector<2x128xf32>
    %373 = arith.addf %367, %372 : vector<2x128xf32>
    %c2_126 = arith.constant 2 : index
    %c6_127 = arith.constant 6 : index
    %374 = memref.load %arg5[%c2_126, %c6_127] : memref<4x8xf32, #tpu.memory_space<smem>>
    %375 = vector.extract_strided_slice %3 {offsets = [2, 0, 0], sizes = [1, 2, 128], strides = [1, 1, 1]} : vector<4x2x128xf32> to vector<1x2x128xf32>
    %376 = vector.shape_cast %375 : vector<1x2x128xf32> to vector<2x128xf32>
    %377 = vector.broadcast %374 : f32 to vector<2x128xf32>
    %378 = arith.mulf %377, %376 : vector<2x128xf32>
    %379 = arith.addf %373, %378 : vector<2x128xf32>
    %c3_128 = arith.constant 3 : index
    %c6_129 = arith.constant 6 : index
    %380 = memref.load %arg5[%c3_128, %c6_129] : memref<4x8xf32, #tpu.memory_space<smem>>
    %381 = vector.extract_strided_slice %3 {offsets = [3, 0, 0], sizes = [1, 2, 128], strides = [1, 1, 1]} : vector<4x2x128xf32> to vector<1x2x128xf32>
    %382 = vector.shape_cast %381 : vector<1x2x128xf32> to vector<2x128xf32>
    %383 = vector.broadcast %380 : f32 to vector<2x128xf32>
    %384 = arith.mulf %383, %382 : vector<2x128xf32>
    %385 = arith.addf %379, %384 : vector<2x128xf32>
    %c6_130 = arith.constant 6 : index
    %386 = memref.load %arg7[%c6_130] : memref<8xf32, #tpu.memory_space<smem>>
    %387 = vector.broadcast %386 : f32 to vector<2x128xf32>
    %388 = arith.addf %385, %387 : vector<2x128xf32>
    %cst_131 = arith.constant 0.000000e+00 : f32
    %389 = vector.broadcast %cst_131 : f32 to vector<2x128xf32>
    %390 = arith.maximumf %388, %389 : vector<2x128xf32>
    %c6_132 = arith.constant 6 : index
    %391 = memref.load %arg6[%c6_132] : memref<8xf32, #tpu.memory_space<smem>>
    %392 = vector.broadcast %391 : f32 to vector<2x128xf32>
    %393 = arith.mulf %392, %390 : vector<2x128xf32>
    %394 = arith.addf %338, %393 : vector<2x128xf32>
    %c0_133 = arith.constant 0 : index
    %c7 = arith.constant 7 : index
    %395 = memref.load %arg4[%c0_133, %c7] : memref<4x8xf32, #tpu.memory_space<smem>>
    %396 = vector.extract_strided_slice %1 {offsets = [0, 0, 0], sizes = [1, 2, 128], strides = [1, 1, 1]} : vector<4x2x128xf32> to vector<1x2x128xf32>
    %397 = vector.shape_cast %396 : vector<1x2x128xf32> to vector<2x128xf32>
    %398 = vector.broadcast %395 : f32 to vector<2x128xf32>
    %399 = arith.mulf %398, %397 : vector<2x128xf32>
    %c1_134 = arith.constant 1 : index
    %c7_135 = arith.constant 7 : index
    %400 = memref.load %arg4[%c1_134, %c7_135] : memref<4x8xf32, #tpu.memory_space<smem>>
    %401 = vector.extract_strided_slice %1 {offsets = [1, 0, 0], sizes = [1, 2, 128], strides = [1, 1, 1]} : vector<4x2x128xf32> to vector<1x2x128xf32>
    %402 = vector.shape_cast %401 : vector<1x2x128xf32> to vector<2x128xf32>
    %403 = vector.broadcast %400 : f32 to vector<2x128xf32>
    %404 = arith.mulf %403, %402 : vector<2x128xf32>
    %405 = arith.addf %399, %404 : vector<2x128xf32>
    %c2_136 = arith.constant 2 : index
    %c7_137 = arith.constant 7 : index
    %406 = memref.load %arg4[%c2_136, %c7_137] : memref<4x8xf32, #tpu.memory_space<smem>>
    %407 = vector.extract_strided_slice %1 {offsets = [2, 0, 0], sizes = [1, 2, 128], strides = [1, 1, 1]} : vector<4x2x128xf32> to vector<1x2x128xf32>
    %408 = vector.shape_cast %407 : vector<1x2x128xf32> to vector<2x128xf32>
    %409 = vector.broadcast %406 : f32 to vector<2x128xf32>
    %410 = arith.mulf %409, %408 : vector<2x128xf32>
    %411 = arith.addf %405, %410 : vector<2x128xf32>
    %c3_138 = arith.constant 3 : index
    %c7_139 = arith.constant 7 : index
    %412 = memref.load %arg4[%c3_138, %c7_139] : memref<4x8xf32, #tpu.memory_space<smem>>
    %413 = vector.extract_strided_slice %1 {offsets = [3, 0, 0], sizes = [1, 2, 128], strides = [1, 1, 1]} : vector<4x2x128xf32> to vector<1x2x128xf32>
    %414 = vector.shape_cast %413 : vector<1x2x128xf32> to vector<2x128xf32>
    %415 = vector.broadcast %412 : f32 to vector<2x128xf32>
    %416 = arith.mulf %415, %414 : vector<2x128xf32>
    %417 = arith.addf %411, %416 : vector<2x128xf32>
    %c0_140 = arith.constant 0 : index
    %c7_141 = arith.constant 7 : index
    %418 = memref.load %arg5[%c0_140, %c7_141] : memref<4x8xf32, #tpu.memory_space<smem>>
    %419 = vector.extract_strided_slice %3 {offsets = [0, 0, 0], sizes = [1, 2, 128], strides = [1, 1, 1]} : vector<4x2x128xf32> to vector<1x2x128xf32>
    %420 = vector.shape_cast %419 : vector<1x2x128xf32> to vector<2x128xf32>
    %421 = vector.broadcast %418 : f32 to vector<2x128xf32>
    %422 = arith.mulf %421, %420 : vector<2x128xf32>
    %423 = arith.addf %417, %422 : vector<2x128xf32>
    %c1_142 = arith.constant 1 : index
    %c7_143 = arith.constant 7 : index
    %424 = memref.load %arg5[%c1_142, %c7_143] : memref<4x8xf32, #tpu.memory_space<smem>>
    %425 = vector.extract_strided_slice %3 {offsets = [1, 0, 0], sizes = [1, 2, 128], strides = [1, 1, 1]} : vector<4x2x128xf32> to vector<1x2x128xf32>
    %426 = vector.shape_cast %425 : vector<1x2x128xf32> to vector<2x128xf32>
    %427 = vector.broadcast %424 : f32 to vector<2x128xf32>
    %428 = arith.mulf %427, %426 : vector<2x128xf32>
    %429 = arith.addf %423, %428 : vector<2x128xf32>
    %c2_144 = arith.constant 2 : index
    %c7_145 = arith.constant 7 : index
    %430 = memref.load %arg5[%c2_144, %c7_145] : memref<4x8xf32, #tpu.memory_space<smem>>
    %431 = vector.extract_strided_slice %3 {offsets = [2, 0, 0], sizes = [1, 2, 128], strides = [1, 1, 1]} : vector<4x2x128xf32> to vector<1x2x128xf32>
    %432 = vector.shape_cast %431 : vector<1x2x128xf32> to vector<2x128xf32>
    %433 = vector.broadcast %430 : f32 to vector<2x128xf32>
    %434 = arith.mulf %433, %432 : vector<2x128xf32>
    %435 = arith.addf %429, %434 : vector<2x128xf32>
    %c3_146 = arith.constant 3 : index
    %c7_147 = arith.constant 7 : index
    %436 = memref.load %arg5[%c3_146, %c7_147] : memref<4x8xf32, #tpu.memory_space<smem>>
    %437 = vector.extract_strided_slice %3 {offsets = [3, 0, 0], sizes = [1, 2, 128], strides = [1, 1, 1]} : vector<4x2x128xf32> to vector<1x2x128xf32>
    %438 = vector.shape_cast %437 : vector<1x2x128xf32> to vector<2x128xf32>
    %439 = vector.broadcast %436 : f32 to vector<2x128xf32>
    %440 = arith.mulf %439, %438 : vector<2x128xf32>
    %441 = arith.addf %435, %440 : vector<2x128xf32>
    %c7_148 = arith.constant 7 : index
    %442 = memref.load %arg7[%c7_148] : memref<8xf32, #tpu.memory_space<smem>>
    %443 = vector.broadcast %442 : f32 to vector<2x128xf32>
    %444 = arith.addf %441, %443 : vector<2x128xf32>
    %cst_149 = arith.constant 0.000000e+00 : f32
    %445 = vector.broadcast %cst_149 : f32 to vector<2x128xf32>
    %446 = arith.maximumf %444, %445 : vector<2x128xf32>
    %c7_150 = arith.constant 7 : index
    %447 = memref.load %arg6[%c7_150] : memref<8xf32, #tpu.memory_space<smem>>
    %448 = vector.broadcast %447 : f32 to vector<2x128xf32>
    %449 = arith.mulf %448, %446 : vector<2x128xf32>
    %450 = arith.addf %394, %449 : vector<2x128xf32>
    %c0_151 = arith.constant 0 : index
    %451 = memref.load %arg8[%c0_151] : memref<1xf32, #tpu.memory_space<smem>>
    %452 = vector.broadcast %451 : f32 to vector<2x128xf32>
    %453 = arith.addf %450, %452 : vector<2x128xf32>
    %454 = arith.negf %453 : vector<2x128xf32>
    %455 = math.exp %454 : vector<2x128xf32>
    %cst_152 = arith.constant 1.000000e+00 : f32
    %456 = vector.broadcast %cst_152 : f32 to vector<2x128xf32>
    %457 = arith.addf %456, %455 : vector<2x128xf32>
    %458 = arith.divf %456, %457 : vector<2x128xf32>
    %459 = vector.shape_cast %458 : vector<2x128xf32> to vector<1x2x128xf32>
    %460 = vector.broadcast %459 : vector<1x2x128xf32> to vector<4x2x128xf32>
    %461 = arith.mulf %3, %460 : vector<4x2x128xf32>
    %c0_153 = arith.constant 0 : index
    %c0_154 = arith.constant 0 : index
    %c0_155 = arith.constant 0 : index
    %c0_156 = arith.constant 0 : index
    %462 = vector.load %arg9[%c0_153, %c0_154, %c0_155, %c0_156] : memref<1x4x2x128xf32, #tpu.memory_space<vmem>>, vector<1x4x2x128xf32>
    %463 = vector.shape_cast %462 : vector<1x4x2x128xf32> to vector<4x2x128xf32>
    %464 = vector.shape_cast %461 : vector<4x2x128xf32> to vector<1x4x2x128xf32>
    tpu.vector_store %arg9[%c0_153, %c0_154, %c0_155, %c0_156], %464 {strides = array<i32>} : memref<1x4x2x128xf32, #tpu.memory_space<vmem>>, vector<1x4x2x128xf32>,
    return
  }
  func.func @transform_0(%arg0: i32, %arg1: i32) -> (i32, i32, i32, i32) {
    %c0_i32 = arith.constant 0 : i32
    %c0_i32_0 = arith.constant 0 : i32
    %c0_i32_1 = arith.constant 0 : i32
    return %arg0, %c0_i32, %arg1, %c0_i32_0 : i32, i32, i32, i32
  }
  func.func @transform_1(%arg0: i32, %arg1: i32) -> (i32, i32, i32, i32) {
    %c0_i32 = arith.constant 0 : i32
    %c0_i32_0 = arith.constant 0 : i32
    %c0_i32_1 = arith.constant 0 : i32
    return %arg0, %c0_i32, %arg1, %c0_i32_0 : i32, i32, i32, i32
  }
  func.func @transform_2(%arg0: i32, %arg1: i32) -> (i32, i32) {
    %c0_i32 = arith.constant 0 : i32
    %c0_i32_0 = arith.constant 0 : i32
    %c0_i32_1 = arith.constant 0 : i32
    return %c0_i32, %c0_i32_0 : i32, i32
  }
  func.func @transform_3(%arg0: i32, %arg1: i32) -> (i32, i32) {
    %c0_i32 = arith.constant 0 : i32
    %c0_i32_0 = arith.constant 0 : i32
    %c0_i32_1 = arith.constant 0 : i32
    return %c0_i32, %c0_i32_0 : i32, i32
  }
  func.func @transform_4(%arg0: i32, %arg1: i32) -> i32 {
    %c0_i32 = arith.constant 0 : i32
    %c0_i32_0 = arith.constant 0 : i32
    return %c0_i32 : i32
  }
  func.func @transform_5(%arg0: i32, %arg1: i32) -> i32 {
    %c0_i32 = arith.constant 0 : i32
    %c0_i32_0 = arith.constant 0 : i32
    return %c0_i32 : i32
  }
  func.func @transform_6(%arg0: i32, %arg1: i32) -> i32 {
    %c0_i32 = arith.constant 0 : i32
    %c0_i32_0 = arith.constant 0 : i32
    return %c0_i32 : i32
  }
  func.func @transform_7(%arg0: i32, %arg1: i32) -> (i32, i32, i32, i32) {
    %c0_i32 = arith.constant 0 : i32
    %c0_i32_0 = arith.constant 0 : i32
    %c0_i32_1 = arith.constant 0 : i32
    return %arg0, %c0_i32, %arg1, %c0_i32_0 : i32, i32, i32, i32
  }
}

</mosaic_0001>

<bundles_post_ra>
// kernel: tpu_custom_call.1
= control target key start
LH: loop header
LB: loop body
LE: loop exit
PB: predicated region body
PF: predicated region fallthrough
CT: control target
= control target key end

     0   :  { %s2023_s0 = inlined_call_operand.hbm [shape: f32[2,4,2,128], index: 0, kind: input, shape index: {}]   ;;  %s2024_s1 = inlined_call_operand.hbm [shape: f32[2,4,2,128], index: 1, kind: input, shape index: {}]   ;;  %s2025_s2 = inlined_call_operand.vmem [shape: f32[4,8], index: 2, kind: input, shape index: {}]   ;;  %s2026_s3 = inlined_call_operand.vmem [shape: f32[4,8], index: 3, kind: input, shape index: {}]   ;;  %s2027_s4 = inlined_call_operand.vmem [shape: f32[8], index: 4, kind: input, shape index: {}]   ;;  %s2028_s5 = inlined_call_operand.vmem [shape: f32[8], index: 5, kind: input, shape index: {}]   ;;  %s2029_s6 = inlined_call_operand.<no memory space> [shape: f32[1], index: 6, kind: input, shape index: {}]   ;;  %s2030_s7 = inlined_call_operand.hbm [shape: f32[2,4,2,128], index: 7, kind: output, shape index: {}]  }
   0x1   :  { %2037 = sst [smem:[#allocation22_spill]] %s2023_s0 }
   0x2   :  { %2038 = sst [smem:[#allocation23_spill]] %s2025_s2 }
   0x3   :  { %2039 = sst [smem:[#allocation24_spill]] %s2026_s3 }
   0x4   :  { %2040 = sst [smem:[#allocation25_spill]] %s2027_s4 }
   0x5   :  { %2041 = sst [smem:[#allocation26_spill]] %s2028_s5 }
   0x6   :  { %12 = sst [smem:[#allocation2]] %s2029_s6 }
   0x7   :  { %13 = vsyncpa [#allocation4], 0 }
   0x8   :  { %15 = vsyncpa [#allocation4 + $0x1], 0 }
   0x9   :  { %16 = vsyncpa [#allocation8], 0 }
   0xa   :  { %18 = vsyncpa [#allocation8 + $0x1], 0 }
   0xb   :  { %19 = vsyncpa [#allocation6], 0 }
   0xc   :  { %20 = vsyncpa [#allocation11], 0 }
   0xd   :  { %21 = vsyncpa [#allocation14], 0 }
   0xe   :  { %22 = vsyncpa [#allocation5], 0 }
   0xf   :  { %24 = vsyncpa [#allocation5 + $0x1], 0  ;;  %s1409_s26 = smov 0   ;;  %s1411_s27 = smov 0  }
  0x10   :  { %s1413_s28 = smov 0   ;;  %s1415_s29 = smov 0  }
  0x11   :  { %s1417_s30 = smov 0   ;;  %s1419_s6 = smov 0  }
  0x12 LB: > { %s912_s8 = sadd.s32 4294967295, %s1353_s6   ;;  %s913_s9 = sadd.s32 4294967294, %s1353_s6   ;;  %s1353_s6 = sphi %s1419_s6, %s30_s6   ;;  %s1349_s30 = sphi %s1417_s30, %s2068_s30   ;;  %s1345_s29 = sphi %s1415_s29, %s2067_s29   ;;  %s1341_s28 = sphi %s1413_s28, %s2066_s28   ;;  %s1337_s27 = sphi %s1411_s27, %s2065_s27   ;;  %s1333_s26 = sphi %s1409_s26, %s2064_s26  }
  0x13   : > { %p64_p0 = scmp.ne.s32.totalorder %s1337_s27, %s1333_s26  ;;  %p1443_p1 = scmp.eq.s32.totalorder %s912_s8, 0 }
  0x14   : > { %p1447_p2 = scmp.eq.s32.totalorder %s912_s8, 1  ;;  %p229_p3 = scmp.eq.s32.totalorder %s913_s9, 1 }
  0x15   : > { %s2042_s10 = scalar_select %p1443_p1, 1, 0 }
  0x16   : > { %s2043_s11 = scalar_select %p1447_p2, 1, 0 }
  0x17   : > { %p1453_p4 = por %p1443_p1, %p64_p0  ;;  %p914_p5 = scmp.ge.s32.totalorder %s1353_s6, 1 }
  0x18   : > { %p1458_p6 = por %p229_p3, %p64_p0  ;;  %p236_p7 = scmp.lt.s32.totalorder %s1353_s6, 3 }
  0x19   : > { %s2044_s12 = scalar_select %p1453_p4, 1, 0 }
  0x1a   : > { %s2045_s13 = scalar_select %p1458_p6, 1, 0 }
  0x1b   : > { %s2046_s3 = sld [smem:[#allocation24_spill]]  ;;  %p1466_p8 = pnand %p914_p5, %p236_p7 }
  0x1c   : > { %s2048_s2 = sld [smem:[#allocation23_spill]]  ;;  %s2050_s4 = sld [smem:[#allocation25_spill]] }
  0x1d   : > { %s2047_s17 = scalar_select %p1466_p8, 1, 0 }
  0x1e   : > { %p1041_p10 = pneg %p1466_p8 }
  0x20   : > { %p1478_p11 = pnand %p1041_p10, %p1443_p1 }
  0x21   : > { %s260_s16 = sshll.u32 %s2046_s3, 4  ;;  %s261_s16 = int_to_ptr.vmem [resolvable:$true] %s260_s16 }
  0x22   : > { %s249_s20 = sshll.u32 %s2048_s2, 4  ;;  %s271_s24 = sshll.u32 %s2050_s4, 4  ;;  %s250_s20 = int_to_ptr.vmem [resolvable:$true] %s249_s20  ;;  %s1485_s24 = int_to_ptr.vmem [resolvable:$true] %s271_s24 }
  0x23   : > { %s1135_s25 = scalar_lea.vmem %s261_s16, 64  ;;  %p1137_p13 = pneg %p1478_p11 }
  0x24   : > { %p1136_p12 = scmp.ne.s32.totalorder %s261_s16, %s1135_s25  ;;  %p1143_p5 = scmp.lt.s32.totalorder %s261_s16, %s261_s16 }
  0x25   : > { %p1144_p7 = scmp.lt.s32.totalorder %s1135_s25, %s1135_s25 }
  0x26   : > { %p1138_p0 = pnand %p1137_p13, %p1136_p12 }
  0x27   : > { %p1145_p10 = por %p1144_p7, %p1143_p5 }
  0x28   : > { %p1139_p3 = pneg %p1138_p0 }
  0x2a   : > { %p1146_p9 = pnand %p1145_p10, %p1139_p3 }
  0x2c   : > { %1149 = shalt.err (!%p1146_p9)
}
  0x2d   : > { %s1355_s8 = smov [#allocation10]   ;;  %s1150_s9 = scalar_lea.vmem %s250_s20, 64 }
  0x2e   : > { %1047 = dma.vmem_to_smem (!%p1478_p11), %s261_s16, 64, %s1355_s8, [#allocation11]  }
  0x2f   : > { %p1151_p6 = scmp.ne.s32.totalorder %s250_s20, %s1150_s9  ;;  %p1158_p8 = scmp.lt.s32.totalorder %s250_s20, %s250_s20 }
  0x30   : > { %p1159_p2 = scmp.lt.s32.totalorder %s1150_s9, %s1150_s9 }
  0x31   : > { %p1153_p1 = pnand %p1151_p6, %p1137_p13 }
  0x32   : > { %p1160_p12 = por %p1159_p2, %p1158_p8 }
  0x33   : > { %p1154_p4 = pneg %p1153_p1 }
  0x35   : > { %p1161_p0 = pnand %p1160_p12, %p1154_p4 }
  0x37   : > { %1164 = shalt.err (!%p1161_p0)
}
  0x38   : > { %s1356_s14 = smov [#allocation9]   ;;  %s2051_s5 = sld [smem:[#allocation26_spill]] }
  0x39   : > { %1044 = dma.vmem_to_smem (!%p1478_p11), %s250_s20, 64, %s1356_s14, [#allocation6]  }
  0x3a   : > { %s1165_s19 = scalar_lea.vmem %s1485_s24, 16  ;;  %p1173_p4 = scmp.lt.s32.totalorder %s1485_s24, %s1485_s24 }
  0x3b   : > { %p1166_p6 = scmp.ne.s32.totalorder %s1485_s24, %s1165_s19  ;;  %p1174_p8 = scmp.lt.s32.totalorder %s1165_s19, %s1165_s19 }
  0x3d   : > { %p1168_p1 = pnand %p1166_p6, %p1137_p13  ;;  %p1175_p9 = por %p1174_p8, %p1173_p4 }
  0x3e   : > { %s282_s18 = sshll.u32 %s2051_s5, 4  ;;  %s283_s18 = int_to_ptr.vmem [resolvable:$true] %s282_s18 }
  0x3f   : > { %p1169_p2 = pneg %p1168_p1 }
  0x41   : > { %p1176_p3 = pnand %p1175_p9, %p1169_p2 }
  0x43   : > { %1179 = shalt.err (!%p1176_p3)
}
  0x44   : > { %s1357_s22 = smov [#allocation12]   ;;  %s1180_s20 = scalar_lea.vmem %s283_s18, 16 }
  0x45   : > { %1050 = dma.vmem_to_smem (!%p1478_p11), %s1485_s24, 16, %s1357_s22, [#allocation11]  }
  0x46   : > { %p1181_p5 = scmp.ne.s32.totalorder %s283_s18, %s1180_s20  ;;  %p1188_p12 = scmp.lt.s32.totalorder %s283_s18, %s283_s18 }
  0x47   : > { %p1189_p0 = scmp.lt.s32.totalorder %s1180_s20, %s1180_s20 }
  0x48   : > { %p1183_p7 = pnand %p1181_p5, %p1137_p13 }
  0x49   : > { %p1190_p6 = por %p1189_p0, %p1188_p12 }
  0x4a   : > { %p1184_p10 = pneg %p1183_p7 }
  0x4c   : > { %p1191_p1 = pnand %p1190_p6, %p1184_p10 }
  0x4e   : > { %1194 = shalt.err (!%p1191_p1)
}
  0x4f   : > { %s1358_s23 = smov [#allocation13]   ;;  %s42_s24 = sadd.s32 1, %s1349_s30 }
  0x50   : > { %1053 = dma.vmem_to_smem (!%p1478_p11), %s283_s18, 16, %s1358_s23, [#allocation14]  }
  0x51   : > { %s51_s25 = sadd.s32 1, %s1341_s28  ;;  %p44_p13 = scmp.ge.s32.totalorder %s42_s24, 2 }
  0x52   : > { %p58_p2 = scmp.ne.s32.totalorder %s1341_s28, %s1337_s27  ;;  %p59_p4 = scmp.eq.s32.totalorder %s1353_s6, 0 }
  0x53   : > { %p1069_p8 = scmp.lt.s32.totalorder %s1353_s6, 2  ;;  %s2070_s24 = smov (%p44_p13, %s42_s24), 0 }
  0x54   : > { %p60_p9 = por %p59_p4, %p58_p2  ;;  %p2052_p3 = scmp.ne.s32.totalorder %s2043_s11, 0 }
  0x55   : > { %s46_s8 = ssub.s32 %s1349_s30, %s2070_s24  ;;  %s1534_s9 = sand.u32 1, %s1341_s28  }
  0x56   : > { %p1527_p5 = por %p2052_p3, %p58_p2  ;;  %p49_p11 = scmp.eq.s32.totalorder %s46_s8, 0 }
  0x57   : > { %s2035_s14 = sshll.u32 %s1534_s9, 3  ;;  %s2036_s15 = sshll.u32 %s1349_s30, 7 }
  0x58   : > { %s1539_s16 = scalar_select %p49_p11, %s1341_s28, %s51_s25  }
  0x59   : > { %s2054_s0 = sld [smem:[#allocation22_spill]]  ;;  %s300_s22 = scalar_lea.vmem [#allocation3], %s2035_s14 }
  0x5a   : > { %s308_s20 = sshll.u32 %s300_s22, 4  ;;  %p1552_p7 = pnand %p1069_p8, %p60_p9  ;;  %s1556_s20 = int_to_ptr.vmem [resolvable:$true] %s308_s20 }
  0x5c   : > { %p1197_p12 = pneg %p1552_p7 }
  0x5f   : > { %s1546_s11 = scalar_lea.hbm %s2054_s0, %s2036_s15  ;;  %s1200_s22 = scalar_lea.hbm %s2054_s0, 256 }
  0x60   : > { %s1195_s8 = scalar_lea.hbm %s1546_s11, 128  ;;  %p1201_p1 = scmp.lt.u32.totalorder %s1546_s11, %s2054_s0 }
  0x61   : > { %p1196_p10 = scmp.ne.s32.totalorder %s1546_s11, %s1195_s8  ;;  %p1202_p13 = scmp.lt.u32.totalorder %s1200_s22, %s1195_s8 }
  0x62   : > { %p1204_p4 = scmp.lt.u32.totalorder %s1195_s8, %s1546_s11 }
  0x63   : > { %p1198_p0 = pnand %p1197_p12, %p1196_p10  ;;  %p1203_p2 = por %p1202_p13, %p1201_p1 }
  0x65   : > { %p1199_p6 = pneg %p1198_p0  ;;  %p1205_p8 = por %p1204_p4, %p1203_p2 }
  0x67   : > { %p1206_p9 = pnand %p1205_p8, %p1199_p6 }
  0x69   : > { %1209 = shalt.err (!%p1206_p9)
}
  0x6a   : > { %s1210_s25 = scalar_lea.vmem %s1556_s20, 128  ;;  %s1359_s18 = smov [#allocation3]  }
  0x6b   : > { %p1211_p3 = scmp.ne.s32.totalorder %s1556_s20, %s1210_s25  ;;  %s1215_s19 = sshll.u32 %s1359_s18, 4  ;;  %s1216_s19 = int_to_ptr.vmem [resolvable:$false] %s1215_s19 }
  0x6c   : > { %s1217_s14 = scalar_lea.vmem %s1216_s19, 256  ;;  %p1218_p0 = scmp.lt.s32.totalorder %s1556_s20, %s1216_s19 }
  0x6d   : > { %p1213_p11 = pnand %p1211_p3, %p1197_p12  ;;  %p1219_p1 = scmp.lt.s32.totalorder %s1217_s14, %s1210_s25 }
  0x6f   : > { %p1214_p10 = pneg %p1213_p11  ;;  %p1220_p13 = por %p1219_p1, %p1218_p0 }
  0x71   : > { %p1221_p2 = pnand %p1220_p13, %p1214_p10 }
  0x73   : > { %1224 = shalt.err (!%p1221_p2)
}
  0x74   : > { %s1360_s15 = smov 32   ;;  %s1361_s8 = smov 2  }
  0x75   : > { %s2056_s22 = scalar_lea.sflag [#allocation4], %s1534_s9  ;;  %s2057_s25 = sshll.u32 %s1349_s30, 7 }
  0x76   : > { %1057 = dma.hbm_to_vmem [thread:$0]  (!%p1552_p7), %s1546_s11, 128, %s1556_s20, %s2056_s22, %s1360_s15, %s1360_s15, %s1361_s8  }
  0x77   : > { %s1594_s14 = scalar_lea.hbm %s2024_s1, %s2057_s25  ;;  %s2058_s0 = sshll.u32 %s1534_s9, 3 }
  0x78   : > { %s322_s2 = scalar_lea.vmem [#allocation7], %s2058_s0  ;;  %s319_s4 = scalar_lea.sflag [#allocation8], %s1534_s9 }
  0x79   : > { %s330_s3 = sshll.u32 %s322_s2, 4  ;;  %s1225_s5 = scalar_lea.hbm %s1594_s14, 128  ;;  %s1598_s3 = int_to_ptr.vmem [resolvable:$true] %s330_s3 }
  0x7a   : > { %p1226_p6 = scmp.ne.s32.totalorder %s1594_s14, %s1225_s5  ;;  %s1230_s22 = scalar_lea.hbm %s2024_s1, 256 }
  0x7b   : > { %p1231_p9 = scmp.lt.u32.totalorder %s1594_s14, %s2024_s1  ;;  %p1232_p3 = scmp.lt.u32.totalorder %s1230_s22, %s1225_s5 }
  0x7c   : > { %p1228_p4 = pnand %p1226_p6, %p1197_p12  ;;  %p1234_p10 = scmp.lt.u32.totalorder %s1225_s5, %s1594_s14 }
  0x7d   : > { %p1233_p11 = por %p1232_p3, %p1231_p9 }
  0x7e   : > { %p1229_p8 = pneg %p1228_p4 }
  0x7f   : > { %p1235_p0 = por %p1234_p10, %p1233_p11 }
  0x81   : > { %p1236_p1 = pnand %p1235_p0, %p1229_p8 }
  0x83   : > { %1239 = shalt.err (!%p1236_p1)
}
  0x84   : > { %s1240_s0 = scalar_lea.vmem %s1598_s3, 128  ;;  %s1362_s2 = smov [#allocation7]  }
  0x85   : > { %p1241_p13 = scmp.ne.s32.totalorder %s1598_s3, %s1240_s0  ;;  %s1245_s19 = sshll.u32 %s1362_s2, 4  ;;  %s1246_s19 = int_to_ptr.vmem [resolvable:$false] %s1245_s19 }
  0x86   : > { %s1247_s11 = scalar_lea.vmem %s1246_s19, 256  ;;  %p1248_p4 = scmp.lt.s32.totalorder %s1598_s3, %s1246_s19 }
  0x87   : > { %p1243_p2 = pnand %p1241_p13, %p1197_p12  ;;  %p1249_p9 = scmp.lt.s32.totalorder %s1247_s11, %s1240_s0 }
  0x89   : > { %p1244_p6 = pneg %p1243_p2  ;;  %p1250_p3 = por %p1249_p9, %p1248_p4 }
  0x8b   : > { %p1251_p11 = pnand %p1250_p3, %p1244_p6 }
  0x8d   : > { %1254 = shalt.err (!%p1251_p11)
}
  0x8e   : > { %1060 = dma.hbm_to_vmem [thread:$0]  (!%p1552_p7), %s1594_s14, 128, %s1598_s3, %s319_s4, %s1360_s15, %s1360_s15, %s1361_s8  }
  0x8f   : > { %p2059_p12 = scmp.ne.s32.totalorder %s2047_s17, 0 }
  0x90   : > { %s1632_s5 = sand.u32 (!%p2059_p12), 1, %s1337_s27   ;;  %p2060_p8 = scmp.ne.s32.totalorder (!%p2059_p12), %s2044_s12, 0 }
  0x91   : > { %342 = sbr.rel (%p2059_p12) target bundleno = 286 (0x11e), region = 48  ;;  %s1635_s20 = sshll.u32 (!%p2059_p12), %s1632_s5, 3 }
  0x92   : > { %s345_s23 = scalar_lea.sflag (!%p2059_p12), [#allocation4], %s1632_s5  ;;  %s348_s22 = scalar_lea.vmem (!%p2059_p12), [#allocation3], %s1635_s20 }
  0x98   : > { %1308 = dma.done.wait (%p2060_p8), %s345_s23, 128  }
  0x99   : > { %1310 = vsyncadd (%p2060_p8), %s345_s23, 4294967168  ;;  %s354_s3 = scalar_lea.sflag [#allocation8], %s1632_s5  ;;  %s1645_s4 = scalar_lea.vmem [#allocation7], %s1635_s20 }
  0x9a   : > { %1312 = dma.done.wait (%p2060_p8), %s354_s3, 128  }
  0x9b   : > { %1314 = vsyncadd (%p2060_p8), %s354_s3, 4294967168  ;;  %p2061_p7 = scmp.ne.s32.totalorder %s2042_s10, 0 }
  0x9d   : > { %1316 = dma.done.wait (%p2061_p7), [#allocation6], 64  }
  0x9e   : > { %1318 = vsyncadd (%p2061_p7), [#allocation6], 4294967232 }
  0x9f   : > { %1320 = dma.done.wait (%p2061_p7), [#allocation11], 80  }
  0xa0   : > { %1322 = vsyncadd (%p2061_p7), [#allocation11], 4294967216 }
  0xa1   : > { %1324 = dma.done.wait (%p2061_p7), [#allocation14], 16  }
  0xa2   : > { %1326 = vsyncadd (%p2061_p7), [#allocation14], 4294967280 }
  0xa3   : > { %378 = sfence }
  0xa4   : > { %s418_s12 = sld [smem:[#allocation9]]  ;;  %v1669_v0 = vld [vmem:[%s348_s22] sm:$0x3]  ;;  %v1671_v1 = vld [vmem:[%s348_s22 + $0x2] sm:$0x3]  ;;  %s1675_s10 = sld [smem:[#allocation9 + $0x1]] }
  0xa5   : > { %s934_s17 = sld [smem:[#allocation9 + $0x80]]  ;;  %v1673_v2 = vld [vmem:[%s348_s22 + $0x4] sm:$0x3]  ;;  %s1677_s0 = sld [smem:[#allocation9 + $0x81]]  ;;  %v1679_v3 = vld [vmem:[%s348_s22 + $0x6] sm:$0x3] }
  0xa6   : > { %s935_s9 = sld [smem:[#allocation9 + $0x100]]  ;;  %s1681_s2 = sld [smem:[#allocation9 + $0x101]]  ;;  %v1686_v6 = vld [vmem:[%s1645_s4] sm:$0x3]  ;;  %v1701_v15 = vld [vmem:[%s1645_s4 + $0x2] sm:$0x3] }
  0xa7   : > { %s936_s15 = sld [smem:[#allocation9 + $0x180]]  ;;  %s1683_s19 = sld [smem:[#allocation9 + $0x181]]  ;;  %v1711_v19 = vld [vmem:[%s1645_s4 + $0x4] sm:$0x3]  ;;  %v1721_v24 = vld [vmem:[%s1645_s4 + $0x6] sm:$0x3] }
  0xa8   : > { %s433_s8 = sld [smem:[#allocation10]]  ;;  %s1690_s11 = sld [smem:[#allocation10 + $0x1]] }
  0xa9   : > { %s1663_s14 = sld [smem:[#allocation10 + $0x80]]  ;;  %s1692_s23 = sld [smem:[#allocation10 + $0x81]] }
  0xaa   : > { %s1665_s25 = sld [smem:[#allocation10 + $0x100]]  ;;  %v419_v4 = vstv %s418_s12  ;;  %s1695_s22 = sld [smem:[#allocation10 + $0x101]]  ;;  %v457_v22 = vstv %s1675_s10 }
  0xab   : > { %s1667_s18 = sld [smem:[#allocation10 + $0x180]]  ;;  %v422_v5 = vstv %s934_s17  ;;  %v420_v7 = vmul.f32 %v419_v4, %v1669_v0  ;;  %s1697_s3 = sld [smem:[#allocation10 + $0x181]]  ;;  %v460_v23 = vstv %s1677_s0  ;;  %v458_v25 = vmul.f32 %v457_v22, %v1669_v0 }
  0xac   : > { %v423_v8 = vmul.f32 %v422_v5, %v1671_v1  ;;  %v426_v9 = vstv %s935_s9  ;;  %s1706_s12 = sld [smem:[#allocation9 + $0x2]]  ;;  %v461_v26 = vmul.f32 %v460_v23, %v1671_v1  ;;  %v464_v27 = vstv %s1681_s2  ;;  %s1738_s4 = sld [smem:[#allocation13 + $0x1]] }
  0xad   : > { %v430_v10 = vstv %s936_s15  ;;  %v427_v11 = vmul.f32 %v426_v9, %v1673_v2  ;;  %s1708_s17 = sld [smem:[#allocation9 + $0x82]]  ;;  %v468_v28 = vstv %s1683_s19  ;;  %v465_v31 = vmul.f32 %v464_v27, %v1673_v2  ;;  %s1747_s0 = sld [smem:[#allocation9 + $0x3]] }
  0xae   : > { %v434_v12 = vstv %s433_s8  ;;  %v424_v13 = vadd.f32 %v423_v8, %v420_v7  ;;  %v431_v14 = vmul.f32 %v430_v10, %v1679_v3  ;;  %s1716_s9 = sld [smem:[#allocation9 + $0x102]]  ;;  %v472_v32 = vstv %s1690_s11  ;;  %s1752_s2 = sld [smem:[#allocation9 + $0x83]] }
  0xaf   : > { %v435_v16 = vmul.f32 %v434_v12, %v1686_v6  ;;  %v438_v17 = vstv %s1663_s14  ;;  %s1718_s15 = sld [smem:[#allocation9 + $0x182]]  ;;  %v462_v33 = vadd.f32 %v461_v26, %v458_v25  ;;  %v469_v34 = vmul.f32 %v468_v28, %v1679_v3  ;;  %s1757_s19 = sld [smem:[#allocation9 + $0x103]] }
  0xb0   : > { %v442_v18 = vstv %s1665_s25  ;;  %v428_v20 = vadd.f32 %v427_v11, %v424_v13  ;;  %s1727_s8 = sld [smem:[#allocation10 + $0x2]]  ;;  %v439_v30 = vmul.f32 %v438_v17, %v1701_v15  ;;  %s1732_s25 = sld [smem:[#allocation13]]  ;;  %v476_v35 = vstv %s1692_s23 }
  0xb1   : > { %v446_v21 = vstv %s1667_s18  ;;  %s1729_s14 = sld [smem:[#allocation10 + $0x82]]  ;;  %v443_v37 = vmul.f32 %v442_v18, %v1711_v19  ;;  %v473_v39 = vmul.f32 %v472_v32, %v1686_v6  ;;  %v466_v40 = vadd.f32 %v465_v31, %v462_v33  ;;  %s1759_s11 = sld [smem:[#allocation9 + $0x183]] }
  0xb2   : > { %v432_v29 = vadd.f32 %v431_v14, %v428_v20  ;;  %s1740_s18 = sld [smem:[#allocation10 + $0x102]]  ;;  %v447_v38 = vmul.f32 %v446_v21, %v1721_v24  ;;  %v477_v41 = vmul.f32 %v476_v35, %v1701_v15  ;;  %v480_v42 = vstv %s1695_s22  ;;  %s1767_s23 = sld [smem:[#allocation10 + $0x3]] }
  0xb3   : > { %s1745_s10 = sld [smem:[#allocation10 + $0x182]]  ;;  %v484_v43 = vstv %s1697_s3  ;;  %v496_v45 = vstv %s1706_s12  ;;  %v499_v46 = vstv %s1708_s17  ;;  %v470_v48 = vadd.f32 %v469_v34, %v466_v40  ;;  %s1769_s22 = sld [smem:[#allocation10 + $0x83]] }
  0xb4   : > { %v436_v36 = vadd.f32 %v435_v16, %v432_v29  ;;  %v503_v47 = vstv %s1716_s9  ;;  %v497_v49 = vmul.f32 %v496_v45, %v1669_v0  ;;  %v500_v50 = vmul.f32 %v499_v46, %v1671_v1  ;;  %s1771_s3 = sld [smem:[#allocation12]]  ;;  %s1778_s12 = sld [smem:[#allocation13 + $0x2]] }
  0xb5   : > { %v504_v51 = vmul.f32 %v503_v47, %v1673_v2  ;;  %v481_v53 = vmul.f32 %v480_v42, %v1711_v19  ;;  %v507_v54 = vstv %s1718_s15  ;;  %v474_v56 = vadd.f32 %v473_v39, %v470_v48  ;;  %s1780_s17 = sld [smem:[#allocation10 + $0x103]]  ;;  %s1789_s15 = sld [smem:[#allocation9 + $0x4]] }
  0xb6   : > { %v440_v44 = vadd.f32 %v439_v30, %v436_v36  ;;  %v511_v55 = vstv %s1727_s8  ;;  %v501_v57 = vadd.f32 %v500_v50, %v497_v49  ;;  %v508_v58 = vmul.f32 %v507_v54, %v1679_v3  ;;  %s1783_s9 = sld [smem:[#allocation10 + $0x183]]  ;;  %s1791_s8 = sld [smem:[#allocation9 + $0x84]] }
  0xb7   : > { %v515_v59 = vstv %s1729_s14  ;;  %v450_v60 = vstv %s1732_s25  ;;  %v485_v61 = vmul.f32 %v484_v43, %v1721_v24  ;;  %v512_v62 = vmul.f32 %v511_v55, %v1686_v6  ;;  %s1795_s14 = sld [smem:[#allocation9 + $0x104]] }
  0xb8   : > { %v444_v52 = vadd.f32 %v443_v37, %v440_v44  ;;  %v478_v4 = vadd.f32 %v477_v41, %v474_v56  ;;  %v505_v5 = vadd.f32 %v504_v51, %v501_v57  ;;  %v519_v7 = vstv %s1740_s18  ;;  %s1801_s25 = sld [smem:[#allocation9 + $0x184]]  ;;  %s1805_s18 = sld [smem:[#allocation12 + $0x1]] }
  0xb9   : > { %v488_v8 = vstv %s1738_s4  ;;  %v516_v9 = vmul.f32 %v515_v59, %v1701_v15  ;;  %v523_v10 = vstv %s1745_s10  ;;  %v535_v11 = vstv %s1747_s0  ;;  %s1803_s4 = sld [smem:[#allocation10 + $0x4]]  ;;  %s1815_s0 = sld [smem:[#allocation12 + $0x2]] }
  0xba   : > { %v448_v63 = vadd.f32 %v447_v38, %v444_v52  ;;  %v482_v12 = vadd.f32 %v481_v53, %v478_v4  ;;  %v509_v13 = vadd.f32 %v508_v58, %v505_v5  ;;  %v536_v14 = vmul.f32 %v535_v11, %v1669_v0  ;;  %s1811_s10 = sld [smem:[#allocation10 + $0x84]] }
  0xbb   : > { %v538_v16 = vstv %s1752_s2  ;;  %v520_v17 = vmul.f32 %v519_v7, %v1711_v19  ;;  %v542_v20 = vstv %s1757_s19  ;;  %v546_v21 = vstv %s1759_s11  ;;  %s1820_s2 = sld [smem:[#allocation13 + $0x3]]  ;;  %s1822_s19 = sld [smem:[#allocation10 + $0x104]] }
  0xbc   : > { %v539_v18 = vmul.f32 %v538_v16, %v1671_v1  ;;  %v451_v22 = vadd.f32 %v450_v60, %v448_v63  ;;  %v486_v23 = vadd.f32 %v485_v61, %v482_v12  ;;  %v513_v25 = vadd.f32 %v512_v62, %v509_v13  ;;  %s1826_s11 = sld [smem:[#allocation10 + $0x184]] }
  0xbd   : > { %v543_v26 = vmul.f32 %v542_v20, %v1673_v2  ;;  %v547_v28 = vmul.f32 %v546_v21, %v1679_v3  ;;  %v550_v29 = vstv %s1767_s23  ;;  %v554_v30 = vstv %s1769_s22  ;;  %s1828_s23 = sld [smem:[#allocation9 + $0x5]] }
  0xbe   : > { %v540_v27 = vadd.f32 %v539_v18, %v536_v14  ;;  %v454_v31 = vstv %s1771_s3  ;;  %v489_v32 = vadd.f32 %v488_v8, %v486_v23  ;;  %v517_v33 = vadd.f32 %v516_v9, %v513_v25  ;;  %s1832_s22 = sld [smem:[#allocation9 + $0x85]] }
  0xbf   : > { %v524_v34 = vmul.f32 %v523_v10, %v1721_v24  ;;  %v527_v35 = vstv %s1778_s12  ;;  %v551_v37 = vmul.f32 %v550_v29, %v1686_v6  ;;  %v558_v38 = vstv %s1780_s17  ;;  %s1834_s3 = sld [smem:[#allocation9 + $0x105]] }
  0xc0   : > { %v544_v36 = vadd.f32 %v543_v26, %v540_v27  ;;  %v452_v39 = vmax.f32 %v451_v22, 0.0  ;;  %v521_v40 = vadd.f32 %v520_v17, %v517_v33  ;;  %v555_v41 = vmul.f32 %v554_v30, %v1701_v15  ;;  %s1842_s12 = sld [smem:[#allocation9 + $0x185]] }
  0xc1   : > { %v562_v42 = vstv %s1783_s9  ;;  %v490_v43 = vmax.f32 %v489_v32, 0.0  ;;  %v574_v45 = vstv %s1789_s15  ;;  %v577_v46 = vstv %s1791_s8  ;;  %s1844_s17 = sld [smem:[#allocation10 + $0x5]]  ;;  %s1847_s9 = sld [smem:[#allocation12 + $0x3]] }
  0xc2   : > { %v548_v44 = vadd.f32 %v547_v28, %v544_v36  ;;  %v525_v47 = vadd.f32 %v524_v34, %v521_v40  ;;  %v559_v48 = vmul.f32 %v558_v38, %v1711_v19  ;;  %v575_v49 = vmul.f32 %v574_v45, %v1669_v0  ;;  %s1853_s15 = sld [smem:[#allocation13 + $0x4]]  ;;  %s1855_s8 = sld [smem:[#allocation10 + $0x85]] }
  0xc3   : > { %v578_v50 = vmul.f32 %v577_v46, %v1671_v1  ;;  %v581_v52 = vstv %s1795_s14  ;;  %v585_v53 = vstv %s1801_s25  ;;  %v589_v54 = vstv %s1803_s4  ;;  %s1859_s14 = sld [smem:[#allocation10 + $0x105]]  ;;  %s1867_s4 = sld [smem:[#allocation9 + $0x6]] }
  0xc4   : > { %v552_v51 = vadd.f32 %v551_v37, %v548_v44  ;;  %v492_v55 = vstv %s1805_s18  ;;  %v528_v56 = vadd.f32 %v527_v35, %v525_v47  ;;  %v582_v58 = vmul.f32 %v581_v52, %v1673_v2  ;;  %s1863_s25 = sld [smem:[#allocation10 + $0x185]]  ;;  %s1869_s18 = sld [smem:[#allocation9 + $0x86]] }
  0xc5   : > { %v579_v57 = vadd.f32 %v578_v50, %v575_v49  ;;  %v563_v60 = vmul.f32 %v562_v42, %v1721_v24  ;;  %v586_v61 = vmul.f32 %v585_v53, %v1679_v3  ;;  %v593_v62 = vstv %s1811_s10  ;;  %s1874_s10 = sld [smem:[#allocation9 + $0x106]] }
  0xc6   : > { %v556_v59 = vadd.f32 %v555_v41, %v552_v51  ;;  %v455_v63 = vmul.f32 %v454_v31, %v452_v39  ;;  %v531_v4 = vstv %s1815_s0  ;;  %v590_v7 = vmul.f32 %v589_v54, %v1686_v6  ;;  %s1879_s0 = sld [smem:[#allocation9 + $0x186]] }
  0xc7   : > { %v583_v5 = vadd.f32 %v582_v58, %v579_v57  ;;  %v493_v8 = vmul.f32 %v492_v55, %v490_v43  ;;  %v566_v10 = vstv %s1820_s2  ;;  %v597_v11 = vstv %s1822_s19  ;;  %s1884_s2 = sld [smem:[#allocation10 + $0x6]] }
  0xc8   : > { %v560_v9 = vadd.f32 %v559_v48, %v556_v59  ;;  %v529_v12 = vmax.f32 %v528_v56, 0.0  ;;  %v594_v14 = vmul.f32 %v593_v62, %v1701_v15  ;;  %v601_v16 = vstv %s1826_s11  ;;  %s1886_s19 = sld [smem:[#allocation10 + $0x86]] }
  0xc9   : > { %v587_v13 = vadd.f32 %v586_v61, %v583_v5  ;;  %v613_v18 = vstv %s1828_s23  ;;  %v616_v20 = vstv %s1832_s22  ;;  %v620_v21 = vstv %s1834_s3  ;;  %s1893_s11 = sld [smem:[#allocation10 + $0x106]]  ;;  %s1897_s23 = sld [smem:[#allocation13 + $0x5]] }
  0xca   : > { %v564_v17 = vadd.f32 %v563_v60, %v560_v9  ;;  %v598_v23 = vmul.f32 %v597_v11, %v1711_v19  ;;  %v614_v25 = vmul.f32 %v613_v18, %v1669_v0  ;;  %v617_v26 = vmul.f32 %v616_v20, %v1671_v1  ;;  %s1899_s22 = sld [smem:[#allocation10 + $0x186]]  ;;  %s1903_s3 = sld [smem:[#allocation9 + $0x7]] }
  0xcb   : > { %v591_v22 = vadd.f32 %v590_v7, %v587_v13  ;;  %v621_v28 = vmul.f32 %v620_v21, %v1673_v2  ;;  %v624_v29 = vstv %s1842_s12  ;;  %v628_v30 = vstv %s1844_s17  ;;  %s1905_s12 = sld [smem:[#allocation9 + $0x87]] }
  0xcc   : > { %v567_v27 = vadd.f32 %v566_v10, %v564_v17  ;;  %v602_v32 = vmul.f32 %v601_v16, %v1721_v24  ;;  %v618_v33 = vadd.f32 %v617_v26, %v614_v25  ;;  %v625_v34 = vmul.f32 %v624_v29, %v1679_v3  ;;  %s1909_s17 = sld [smem:[#allocation9 + $0x107]] }
  0xcd   : > { %v595_v31 = vadd.f32 %v594_v14, %v591_v22  ;;  %v494_v35 = vadd.f32 %v493_v8, %v455_v63  ;;  %v570_v36 = vstv %s1847_s9  ;;  %v605_v37 = vstv %s1853_s15  ;;  %s1915_s9 = sld [smem:[#allocation9 + $0x187]] }
  0xce   : > { %v632_v38 = vstv %s1855_s8  ;;  %v622_v40 = vadd.f32 %v621_v28, %v618_v33  ;;  %v629_v41 = vmul.f32 %v628_v30, %v1686_v6  ;;  %v636_v42 = vstv %s1859_s14  ;;  %s1917_s15 = sld [smem:[#allocation10 + $0x7]]  ;;  %s1921_s8 = sld [smem:[#allocation12 + $0x4]] }
  0xcf   : > { %v599_v39 = vadd.f32 %v598_v23, %v595_v31  ;;  %v532_v43 = vmul.f32 %v531_v4, %v529_v12  ;;  %v568_v44 = vmax.f32 %v567_v27, 0.0  ;;  %v633_v45 = vmul.f32 %v632_v38, %v1701_v15  ;;  %s1926_s14 = sld [smem:[#allocation10 + $0x87]] }
  0xd0   : > { %v640_v46 = vstv %s1863_s25  ;;  %v626_v48 = vadd.f32 %v625_v34, %v622_v40  ;;  %v652_v49 = vstv %s1867_s4  ;;  %v655_v50 = vstv %s1869_s18  ;;  %s1931_s25 = sld [smem:[#allocation13 + $0x6]]  ;;  %s1933_s4 = sld [smem:[#allocation10 + $0x107]] }
  0xd1   : > { %v603_v47 = vadd.f32 %v602_v32, %v599_v39  ;;  %v637_v51 = vmul.f32 %v636_v42, %v1711_v19  ;;  %v653_v52 = vmul.f32 %v652_v49, %v1669_v0  ;;  %v656_v53 = vmul.f32 %v655_v50, %v1671_v1  ;;  %s1937_s18 = sld [smem:[#allocation12 + $0x5]] }
  0xd2   : > { %v659_v54 = vstv %s1874_s10  ;;  %v630_v56 = vadd.f32 %v629_v41, %v626_v48  ;;  %v663_v58 = vstv %s1879_s0  ;;  %v667_v61 = vstv %s1884_s2  ;;  %s1942_s10 = sld [smem:[#allocation10 + $0x187]]  ;;  %s999_s0 = sld [smem:[#allocation12 + $0x6]] }
  0xd3   : > { %v606_v55 = vadd.f32 %v605_v37, %v603_v47  ;;  %v660_v57 = vmul.f32 %v659_v54, %v1673_v2  ;;  %v657_v59 = vadd.f32 %v656_v53, %v653_v52  ;;  %v664_v60 = vmul.f32 %v663_v58, %v1679_v3  ;;  %s1008_s2 = sld [smem:[#allocation13 + $0x7]] }
  0xd4   : > { %v671_v62 = vstv %s1886_s19  ;;  %v533_v63 = vadd.f32 %v532_v43, %v494_v35  ;;  %v634_v4 = vadd.f32 %v633_v45, %v630_v56  ;;  %v641_v5 = vmul.f32 %v640_v46, %v1721_v24  ;;  %s1009_s19 = sld [smem:[#allocation12 + $0x7]] }
  0xd5   : > { %v571_v7 = vmul.f32 %v570_v36, %v568_v44  ;;  %v661_v8 = vadd.f32 %v660_v57, %v657_v59  ;;  %v668_v9 = vmul.f32 %v667_v61, %v1686_v6  ;;  %v675_v10 = vstv %s1893_s11  ;;  %s729_s11 = sld [smem:[#allocation2]] }
  0xd6   : > { %v607_v11 = vmax.f32 %v606_v55, 0.0  ;;  %v638_v12 = vadd.f32 %v637_v51, %v634_v4  ;;  %v644_v13 = vstv %s1897_s23  ;;  %v672_v14 = vmul.f32 %v671_v62, %v1701_v15  ;;  %s1018_s23 = sshll.u32 %s1345_s29, 7  ;;  %s747_s29 = scalar_lea.sflag [#allocation5], %s1632_s5 }
  0xd7   : > { %v665_v16 = vadd.f32 %v664_v60, %v661_v8  ;;  %v679_v17 = vstv %s1899_s22  ;;  %v691_v18 = vstv %s1903_s3  ;;  %v694_v20 = vstv %s1905_s12  ;;  %s409_s22 = scalar_lea.vmem [#allocation15], %s1635_s20 }
  0xd8   : > { %v642_v21 = vadd.f32 %v641_v5, %v638_v12  ;;  %v676_v22 = vmul.f32 %v675_v10, %v1711_v19  ;;  %v692_v23 = vmul.f32 %v691_v18, %v1669_v0  ;;  %v695_v25 = vmul.f32 %v694_v20, %v1671_v1  ;;  %s761_s3 = sshll.u32 %s409_s22, 4  ;;  %s1970_s3 = int_to_ptr.vmem [resolvable:$true] %s761_s3 }
  0xd9   : > { %v669_v26 = vadd.f32 %v668_v9, %v665_v16  ;;  %v698_v27 = vstv %s1909_s17  ;;  %v702_v28 = vstv %s1915_s9  ;;  %v706_v29 = vstv %s1917_s15  ;;  %s1968_s9 = scalar_lea.hbm %s2030_s7, %s1018_s23  ;;  %s1255_s20 = scalar_lea.vmem %s1970_s3, 128 }
  0xda   : > { %v645_v30 = vadd.f32 %v644_v13, %v642_v21  ;;  %v696_v31 = vadd.f32 %v695_v25, %v692_v23  ;;  %v699_v32 = vmul.f32 %v698_v27, %v1673_v2  ;;  %v703_v33 = vmul.f32 %v702_v28, %v1679_v3  ;;  %p1256_p10 = scmp.ne.s32.totalorder %s1970_s3, %s1255_s20  ;;  %s1363_s15 = smov [#allocation15]  }
  0xdb   : > { %v609_v34 = vstv %s1921_s8  ;;  %v673_v35 = vadd.f32 %v672_v14, %v669_v26  ;;  %v680_v36 = vmul.f32 %v679_v17, %v1721_v24  ;;  %v710_v0 = vstv %s1926_s14  ;;  %s1259_s8 = sshll.u32 %s1363_s15, 4  ;;  %s1260_s8 = int_to_ptr.vmem [resolvable:$false] %s1259_s8 }
  0xdc   : > { %v700_v1 = vadd.f32 %v699_v32, %v696_v31  ;;  %v707_v37 = vmul.f32 %v706_v29, %v1686_v6  ;;  %v572_v38 = vadd.f32 %v571_v7, %v533_v63  ;;  %v683_v40 = vstv %s1931_s25  ;;  %p1257_p0 = pnand %p1256_p10, %p1527_p5  ;;  %s1261_s14 = scalar_lea.vmem %s1260_s8, 256 }
  0xdd   : > { %v677_v39 = vadd.f32 %v676_v22, %v673_v35  ;;  %v714_v41 = vstv %s1933_s4  ;;  %v610_v42 = vmul.f32 %v609_v34, %v607_v11  ;;  %v646_v2 = vmax.f32 %v645_v30, 0.0  ;;  %p1262_p13 = scmp.lt.s32.totalorder %s1970_s3, %s1260_s8  ;;  %p1263_p2 = scmp.lt.s32.totalorder %s1261_s14, %s1255_s20 }
  0xde   : > { %v704_v43 = vadd.f32 %v703_v33, %v700_v1  ;;  %v711_v3 = vmul.f32 %v710_v0, %v1701_v15  ;;  %v648_v44 = vstv %s1937_s18  ;;  %v718_v46 = vstv %s1942_s10  ;;  %p1258_p1 = pneg %p1257_p0 }
  0xdf   : > { %v681_v45 = vadd.f32 %v680_v36, %v677_v39  ;;  %v715_v48 = vmul.f32 %v714_v41, %v1711_v19  ;;  %v611_v50 = vadd.f32 %v610_v42, %v572_v38  ;;  %v649_v51 = vmul.f32 %v648_v44, %v646_v2  ;;  %p1264_p6 = por %p1263_p2, %p1262_p13 }
  0xe0   : > { %v708_v47 = vadd.f32 %v707_v37, %v704_v43  ;;  %v719_v53 = vmul.f32 %v718_v46, %v1721_v24  ;;  %v687_v55 = vstv %s999_s0  ;;  %v722_v57 = vstv %s1008_s2 }
  0xe1   : > { %v684_v49 = vadd.f32 %v683_v40, %v681_v45  ;;  %v650_v58 = vadd.f32 %v649_v51, %v611_v50  ;;  %v726_v62 = vstv %s1009_s19  ;;  %v730_v7 = vstv %s729_s11  ;;  %p1265_p4 = pnand %p1264_p6, %p1258_p1 }
  0xe2   : > { %v712_v52 = vadd.f32 %v711_v3, %v708_v47 }
  0xe3   : > { %v685_v54 = vmax.f32 %v684_v49, 0.0 }
  0xe4   : > { %v716_v56 = vadd.f32 %v715_v48, %v712_v52 }
  0xe5   : > { %v688_v59 = vmul.f32 %v687_v55, %v685_v54 }
  0xe6   : > { %v720_v60 = vadd.f32 %v719_v53, %v716_v56 }
  0xe7   : > { %v689_v63 = vadd.f32 %v688_v59, %v650_v58 }
  0xe8   : > { %v723_v61 = vadd.f32 %v722_v57, %v720_v60 }
  0xea   : > { %v724_v4 = vmax.f32 %v723_v61, 0.0 }
  0xec   : > { %v727_v5 = vmul.f32 %v726_v62, %v724_v4 }
  0xee   : > { %v728_v8 = vadd.f32 %v727_v5, %v689_v63 }
  0xf0   : > { %v731_v9 = vadd.f32 %v730_v7, %v728_v8 }
  0xf2   : > { %v1010_v10 = vmul.f32 -1.442695, %v731_v9 }
  0xf4   : > { %1131 = vpow2.f32 %v1010_v10 }
  0xfe   : > { %v1132_v11 = vpop.eup %1131 }
  0xff   : > { %v735_v12 = vadd.f32 1.0, %v1132_v11 }
 0x101   : > { %1133 = vrcp.f32 %v735_v12 }
 0x10b   : > { %v1134_v13 = vpop.eup %1133 }
 0x10c   : > { %v738_v14 = vmul.f32 %v1134_v13, %v1686_v6  ;;  %v739_v16 = vmul.f32 %v1134_v13, %v1701_v15  ;;  %v740_v17 = vmul.f32 %v1134_v13, %v1711_v19  ;;  %v741_v18 = vmul.f32 %v1134_v13, %v1721_v24 }
 0x10e   : > { %742 = vst [vmem:[%s409_s22] sm:$0x3] %v738_v14  ;;  %743 = vst [vmem:[%s409_s22 + $0x2] sm:$0x3] %v739_v16 }
 0x10f   : > { %744 = vst [vmem:[%s409_s22 + $0x4] sm:$0x3] %v740_v17  ;;  %745 = vst [vmem:[%s409_s22 + $0x6] sm:$0x3] %v741_v18 }
 0x110   : > { %1268 = shalt.err (!%p1265_p4)
}
 0x111   : > { %s1269_s25 = scalar_lea.hbm %s1968_s9, 128  ;;  %s1273_s10 = scalar_lea.hbm %s2030_s7, 256 }
 0x112   : > { %p1270_p9 = scmp.ne.s32.totalorder %s1968_s9, %s1269_s25  ;;  %p1274_p12 = scmp.lt.u32.totalorder %s1968_s9, %s2030_s7 }
 0x113   : > { %p1275_p8 = scmp.lt.u32.totalorder %s1273_s10, %s1269_s25  ;;  %p1277_p10 = scmp.lt.u32.totalorder %s1269_s25, %s1968_s9 }
 0x114   : > { %p1271_p3 = pnand %p1270_p9, %p1527_p5 }
 0x115   : > { %p1276_p7 = por %p1275_p8, %p1274_p12 }
 0x116   : > { %p1272_p11 = pneg %p1271_p3 }
 0x117   : > { %p1278_p0 = por %p1277_p10, %p1276_p7 }
 0x119   : > { %p1279_p1 = pnand %p1278_p0, %p1272_p11 }
 0x11b   : > { %1282 = shalt.err (!%p1279_p1)
}
 0x11c   : > { %s1364_s19 = smov 32   ;;  %s1365_s11 = smov 2  }
 0x11d   : > { %1039 = dma.vmem_to_hbm [thread:$0]  (%p1527_p5), %s1970_s3, 128, %s1968_s9, %s747_s29, %s1364_s19, %s1364_s19, %s1365_s11  }
 0x11e PF: > { %s776_s23 = sand.u32 1, %s1333_s26   ;;  %p2062_p13 = scmp.ne.s32.totalorder %s2045_s13, 0 }
 0x11f   : > { %p2063_p2 = scmp.ge.s32.totalorder %s1353_s6, 2  ;;  %s777_s22 = scalar_lea.sflag [#allocation5], %s776_s23 }
 0x121   : > { %p1062_p6 = pnand %p2063_p2, %p2062_p13 }
 0x123   : > { %1328 = dma.done.wait (!%p1062_p6), %s777_s22, 128  }
 0x124   : > { %1330 = vsyncadd (!%p1062_p6), %s777_s22, 4294967168  ;;  %s30_s6 = sadd.s32 1, %s1353_s6   ;;  %s2064_s26 = smov %s1337_s27 }
 0x125   : > { %p27_p4 = scmp.ge.s32.totalorder %s30_s6, 4   ;;  %s2065_s27 = smov %s1341_s28 }
 0x126   : > { %s2066_s28 = smov %s1539_s16  ;;  %s2067_s29 = smov %s1349_s30 }
 0x127   : > { %s2068_s30 = smov %s2070_s24  ;;  %29 = sbr.rel (!%p27_p4) target bundleno = 18 (0x12), region = 123 }
 0x12e   :  { %782 = vsyncpa [#allocation4], 1 }
 0x12f   :  { %784 = vsyncpa [#allocation4 + $0x1], 1 }
 0x130   :  { %785 = vsyncpa [#allocation8], 1 }
 0x131   :  { %787 = vsyncpa [#allocation8 + $0x1], 1 }
 0x132   :  { %788 = vsyncpa [#allocation5], 1 }
 0x133   :  { %790 = vsyncpa [#allocation5 + $0x1], 1 }
 0x134   :  { %791 = vsyncpa [#allocation6], 1 }
 0x135   :  { %793 = vsyncpa [#allocation6 + $0x1], 1 }
 0x136   :  { %794 = vsyncpa [#allocation11], 1 }
 0x137   :  { %795 = vsyncpa [#allocation14], 1 }

</bundles_post_ra>
